<compile_context>
chip_gen: v7x
topology: tpu7x:2x2x1
jax: 0.10.0
libtpu: 0.0.40
codegen_flags: <defaults>
</compile_context>

<pallas_src>
import math

import jax
import jax.numpy as jnp
from jax.experimental import pallas as pl
from jax.experimental.pallas import tpu as pltpu

# ---- synthetic config (small shapes, consistent with the module) -----------
B = 2            # batch
T = 8            # sequence length
EMBEDDING = 32   # config.embedding
QK_PROJ = 16     # config.qk_projection
HEADS = 4        # config.multi_heads
LAYER1 = 64      # config.transformer_block_layer1
EPS = 1e-5       # nn.LayerNorm default eps

D_QK = QK_PROJ // HEADS          # 4
D_V = EMBEDDING // HEADS         # 8
QKV_W = 2 * QK_PROJ + EMBEDDING  # 64
ROWS = B * T                     # 16

_HIGHEST = jax.lax.Precision.HIGHEST


def _layernorm(x, g, b):
    mu = jnp.mean(x, axis=-1, keepdims=True)
    var = jnp.mean((x - mu) ** 2, axis=-1, keepdims=True)
    return (x - mu) * jax.lax.rsqrt(var + EPS) * g + b


def transformer_block_kernel(x_ref, wqkv_ref, w1_ref, w2_ref, ve_ref, vl_ref,
                             out_ref):
    # Packed parameter rows (1-D vectors, broadcast over the feature dim).
    ln1_g, ln1_b = ve_ref[0], ve_ref[1]
    ln2_g, ln2_b = ve_ref[2], ve_ref[3]
    ln4_g, ln4_b = ve_ref[4], ve_ref[5]
    b2 = ve_ref[6]
    ln3_g, ln3_b, b1 = vl_ref[0], vl_ref[1], vl_ref[2]

    x = x_ref[...]                                     # (B*T, E) flattened rows
    xln = _layernorm(x, ln1_g, ln1_b)                  # attention path only

    # Fused Q/K/V projection: one (16,32)@(32,64) matmul, result stays in vregs.
    qkv = jnp.dot(xln, wqkv_ref[...], precision=_HIGHEST,
                  preferred_element_type=jnp.float32)  # (B*T, 2P+E)
    qkv3 = qkv.reshape(B, T, QKV_W)                    # sublane-aligned split

    # Multi-head attention: static head loop, batched over B via 3-D einsums.
    scale = 1.0 / math.sqrt(float(T))
    head_outs = []
    for h in range(HEADS):
        qh = qkv3[:, :, h * D_QK:(h + 1) * D_QK]                           # (B,T,dqk)
        kh = qkv3[:, :, QK_PROJ + h * D_QK:QK_PROJ + (h + 1) * D_QK]       # (B,T,dqk)
        vh = qkv3[:, :, 2 * QK_PROJ + h * D_V:2 * QK_PROJ + (h + 1) * D_V]  # (B,T,dv)

        s = jnp.einsum('btd,bsd->bts', qh, kh, precision=_HIGHEST,
                       preferred_element_type=jnp.float32) * scale         # (B,T,T)
        s = s - jnp.max(s, axis=-1, keepdims=True)
        p = jnp.exp(s)
        p = p / jnp.sum(p, axis=-1, keepdims=True)     # exact divide (numerics)
        head_outs.append(
            jnp.einsum('bts,bsd->btd', p, vh, precision=_HIGHEST,
                       preferred_element_type=jnp.float32))                # (B,T,dv)

    attn = jnp.concatenate(head_outs, axis=-1).reshape(ROWS, EMBEDDING)

    # First residual: original input + attention(LN(input)), kept as a value.
    feat = x + attn                                    # (B*T, E)

    # MLP: LN -> Linear -> LN -> ReLU -> Linear -> LN, single flattened matmuls.
    h1 = _layernorm(feat, ln2_g, ln2_b)
    h1 = jnp.dot(h1, w1_ref[...], precision=_HIGHEST,
                 preferred_element_type=jnp.float32) + b1                  # (B*T, L1)
    h1 = _layernorm(h1, ln3_g, ln3_b)
    h1 = jnp.maximum(h1, 0.0)
    h2 = jnp.dot(h1, w2_ref[...], precision=_HIGHEST,
                 preferred_element_type=jnp.float32) + b2                  # (B*T, E)
    h2 = _layernorm(h2, ln4_g, ln4_b)

    # Second residual; single store to the output ref.
    out_ref[...] = feat + h2


def pack_params(params):
    (ln1_g, ln1_b, wq, wk, wv,
     ln2_g, ln2_b, w1, b1, ln3_g, ln3_b, w2, b2, ln4_g, ln4_b) = params
    wqkv = jnp.concatenate([wq, wk, wv], axis=1)                       # (E, 2P+E)
    vec_e = jnp.stack([ln1_g, ln1_b, ln2_g, ln2_b, ln4_g, ln4_b, b2])  # (7, E)
    vec_l = jnp.stack([ln3_g, ln3_b, b1])                              # (3, L1)
    return wqkv, w1, w2, vec_e, vec_l


def transformer_block(x, params):
    """x: (B, T, E) float32; params: tuple of 15 unpacked parameter arrays."""
    wqkv, w1, w2, vec_e, vec_l = pack_params(params)
    x_flat = x.reshape(ROWS, EMBEDDING)                # free, done in the wrapper
    vmem = pltpu.MemorySpace.VMEM
    out_flat = pl.pallas_call(
        transformer_block_kernel,
        out_shape=jax.ShapeDtypeStruct((ROWS, EMBEDDING), jnp.float32),
        in_specs=[pl.BlockSpec(memory_space=vmem)] * 6,
        out_specs=pl.BlockSpec(memory_space=vmem),
    )(x_flat, wqkv, w1, w2, vec_e, vec_l)
    return out_flat.reshape(B, T, EMBEDDING)


# ---- pure-JAX reference (mirrors the PyTorch forward) ----------------------
def reference(x, params):
    (ln1_g, ln1_b, wq, wk, wv,
     ln2_g, ln2_b, w1, b1, ln3_g, ln3_b, w2, b2, ln4_g, ln4_b) = params

    def mm(a, b):
        return jnp.matmul(a, b, precision=_HIGHEST)

    xln = _layernorm(x, ln1_g, ln1_b)
    q = mm(xln, wq)
    k = mm(xln, wk)
    v = mm(xln, wv)
    qh = q.reshape(B, T, HEADS, -1).transpose(0, 2, 1, 3)          # (B,H,T,dqk)
    kh = k.reshape(B, T, HEADS, -1).transpose(0, 2, 3, 1)          # (B,H,dqk,T)
    att = jax.nn.softmax(mm(qh, kh) / jnp.sqrt(jnp.float32(T)), axis=-1)
    vh = v.reshape(B, T, HEADS, -1).transpose(0, 2, 1, 3)          # (B,H,T,dv)
    vatt = mm(att, vh).transpose(0, 2, 1, 3).reshape(B, T, -1)
    feat = x + vatt

    h1 = _layernorm(feat, ln2_g, ln2_b)
    h1 = mm(h1, w1) + b1
    h1 = _layernorm(h1, ln3_g, ln3_b)
    h1 = jnp.maximum(h1, 0.0)
    h2 = mm(h1, w2) + b2
    h2 = _layernorm(h2, ln4_g, ln4_b)
    return feat + h2


def make_params(key):
    ks = jax.random.split(key, 8)
    # attention projections: uniform(0, 1) like the PyTorch init
    wq = jax.random.uniform(ks[0], (EMBEDDING, QK_PROJ), jnp.float32)
    wk = jax.random.uniform(ks[1], (EMBEDDING, QK_PROJ), jnp.float32)
    wv = jax.random.uniform(ks[2], (EMBEDDING, EMBEDDING), jnp.float32)
    # layer norms: default torch init (gamma=1, beta=0), 1-D vectors
    ln1_g = jnp.ones((EMBEDDING,), jnp.float32)
    ln1_b = jnp.zeros((EMBEDDING,), jnp.float32)
    ln2_g = jnp.ones((EMBEDDING,), jnp.float32)
    ln2_b = jnp.zeros((EMBEDDING,), jnp.float32)
    ln3_g = jnp.ones((LAYER1,), jnp.float32)
    ln3_b = jnp.zeros((LAYER1,), jnp.float32)
    ln4_g = jnp.ones((EMBEDDING,), jnp.float32)
    ln4_b = jnp.zeros((EMBEDDING,), jnp.float32)
    # linears: kaiming-uniform-style init, stored as (in, out)
    bnd1 = math.sqrt(6.0 / EMBEDDING)
    w1 = jax.random.uniform(ks[3], (EMBEDDING, LAYER1), jnp.float32, -bnd1, bnd1)
    b1 = jax.random.uniform(ks[4], (LAYER1,), jnp.float32,
                            -1.0 / math.sqrt(EMBEDDING), 1.0 / math.sqrt(EMBEDDING))
    bnd2 = math.sqrt(6.0 / LAYER1)
    w2 = jax.random.uniform(ks[5], (LAYER1, EMBEDDING), jnp.float32, -bnd2, bnd2)
    b2 = jax.random.uniform(ks[6], (EMBEDDING,), jnp.float32,
                            -1.0 / math.sqrt(LAYER1), 1.0 / math.sqrt(LAYER1))
    return (ln1_g, ln1_b, wq, wk, wv,
            ln2_g, ln2_b, w1, b1, ln3_g, ln3_b, w2, b2, ln4_g, ln4_b)


if __name__ == "__main__":
    key = jax.random.PRNGKey(0)
    kx, kp = jax.random.split(key)
    x = jax.random.normal(kx, (B, T, EMBEDDING), jnp.float32)
    params = make_params(kp)

    out = transformer_block(x, params)
    out = jax.block_until_ready(out)

    ref = jax.block_until_ready(reference(x, params))
    assert out.shape == (B, T, EMBEDDING)
    # Kernel and reference use identical formulas, exact softmax divide and
    # HIGHEST-precision matmuls; differences are only f32 reduction ordering.
    assert jnp.allclose(out, ref, rtol=1e-3, atol=1e-3), (
        "mismatch vs pure-JAX reference")
    print("KERNEL_OK")
</pallas_src>

<mosaic_0001>
module attributes {stable_mosaic.version = 11 : i64} {
  func.func @transformer_block_kernel(%arg0: memref<16x32xf32, #tpu.memory_space<vmem>>, %arg1: memref<32x64xf32, #tpu.memory_space<vmem>>, %arg2: memref<32x64xf32, #tpu.memory_space<vmem>>, %arg3: memref<64x32xf32, #tpu.memory_space<vmem>>, %arg4: memref<7x32xf32, #tpu.memory_space<vmem>>, %arg5: memref<3x64xf32, #tpu.memory_space<vmem>>, %arg6: memref<16x32xf32, #tpu.memory_space<vmem>>) attributes {dimension_semantics = [], scalar_prefetch = 0 : i64, scratch_operands = 0 : i64, tpu.core_type = #tpu.core_type<tc>} {
    %c0 = arith.constant 0 : index
    %c0_0 = arith.constant 0 : index
    %0 = vector.load %arg4[%c0, %c0_0] : memref<7x32xf32, #tpu.memory_space<vmem>>, vector<1x32xf32>
    %1 = vector.shape_cast %0 : vector<1x32xf32> to vector<32xf32>
    %c1 = arith.constant 1 : index
    %c0_1 = arith.constant 0 : index
    %2 = vector.load %arg4[%c1, %c0_1] : memref<7x32xf32, #tpu.memory_space<vmem>>, vector<1x32xf32>
    %3 = vector.shape_cast %2 : vector<1x32xf32> to vector<32xf32>
    %c2 = arith.constant 2 : index
    %c0_2 = arith.constant 0 : index
    %4 = vector.load %arg4[%c2, %c0_2] : memref<7x32xf32, #tpu.memory_space<vmem>>, vector<1x32xf32>
    %5 = vector.shape_cast %4 : vector<1x32xf32> to vector<32xf32>
    %c3 = arith.constant 3 : index
    %c0_3 = arith.constant 0 : index
    %6 = vector.load %arg4[%c3, %c0_3] : memref<7x32xf32, #tpu.memory_space<vmem>>, vector<1x32xf32>
    %7 = vector.shape_cast %6 : vector<1x32xf32> to vector<32xf32>
    %c4 = arith.constant 4 : index
    %c0_4 = arith.constant 0 : index
    %8 = vector.load %arg4[%c4, %c0_4] : memref<7x32xf32, #tpu.memory_space<vmem>>, vector<1x32xf32>
    %9 = vector.shape_cast %8 : vector<1x32xf32> to vector<32xf32>
    %c5 = arith.constant 5 : index
    %c0_5 = arith.constant 0 : index
    %10 = vector.load %arg4[%c5, %c0_5] : memref<7x32xf32, #tpu.memory_space<vmem>>, vector<1x32xf32>
    %11 = vector.shape_cast %10 : vector<1x32xf32> to vector<32xf32>
    %c6 = arith.constant 6 : index
    %c0_6 = arith.constant 0 : index
    %12 = vector.load %arg4[%c6, %c0_6] : memref<7x32xf32, #tpu.memory_space<vmem>>, vector<1x32xf32>
    %13 = vector.shape_cast %12 : vector<1x32xf32> to vector<32xf32>
    %c0_7 = arith.constant 0 : index
    %c0_8 = arith.constant 0 : index
    %14 = vector.load %arg5[%c0_7, %c0_8] : memref<3x64xf32, #tpu.memory_space<vmem>>, vector<1x64xf32>
    %15 = vector.shape_cast %14 : vector<1x64xf32> to vector<64xf32>
    %c1_9 = arith.constant 1 : index
    %c0_10 = arith.constant 0 : index
    %16 = vector.load %arg5[%c1_9, %c0_10] : memref<3x64xf32, #tpu.memory_space<vmem>>, vector<1x64xf32>
    %17 = vector.shape_cast %16 : vector<1x64xf32> to vector<64xf32>
    %c2_11 = arith.constant 2 : index
    %c0_12 = arith.constant 0 : index
    %18 = vector.load %arg5[%c2_11, %c0_12] : memref<3x64xf32, #tpu.memory_space<vmem>>, vector<1x64xf32>
    %19 = vector.shape_cast %18 : vector<1x64xf32> to vector<64xf32>
    %c0_13 = arith.constant 0 : index
    %c0_14 = arith.constant 0 : index
    %20 = vector.load %arg0[%c0_13, %c0_14] : memref<16x32xf32, #tpu.memory_space<vmem>>, vector<16x32xf32>
    %cst = arith.constant dense<0.000000e+00> : vector<16xf32>
    %21 = vector.multi_reduction <add>, %20, %cst [1] : vector<16x32xf32> to vector<16xf32>
    %22 = vector.shape_cast %21 : vector<16xf32> to vector<16x1xf32>
    %cst_15 = arith.constant 3.200000e+01 : f32
    %23 = vector.broadcast %cst_15 : f32 to vector<16x1xf32>
    %24 = arith.divf %22, %23 : vector<16x1xf32>
    %25 = vector.broadcast %24 : vector<16x1xf32> to vector<16x32xf32>
    %26 = arith.subf %20, %25 : vector<16x32xf32>
    %27 = arith.mulf %26, %26 : vector<16x32xf32>
    %cst_16 = arith.constant dense<0.000000e+00> : vector<16xf32>
    %28 = vector.multi_reduction <add>, %27, %cst_16 [1] : vector<16x32xf32> to vector<16xf32>
    %29 = vector.shape_cast %28 : vector<16xf32> to vector<16x1xf32>
    %cst_17 = arith.constant 3.200000e+01 : f32
    %30 = vector.broadcast %cst_17 : f32 to vector<16x1xf32>
    %31 = arith.divf %29, %30 : vector<16x1xf32>
    %32 = vector.broadcast %24 : vector<16x1xf32> to vector<16x32xf32>
    %33 = arith.subf %20, %32 : vector<16x32xf32>
    %cst_18 = arith.constant 9.99999974E-6 : f32
    %34 = vector.broadcast %cst_18 : f32 to vector<16x1xf32>
    %35 = arith.addf %31, %34 : vector<16x1xf32>
    %36 = math.rsqrt %35 : vector<16x1xf32>
    %37 = vector.broadcast %36 : vector<16x1xf32> to vector<16x32xf32>
    %38 = arith.mulf %33, %37 : vector<16x32xf32>
    %39 = vector.shape_cast %1 : vector<32xf32> to vector<1x32xf32>
    %40 = vector.broadcast %39 : vector<1x32xf32> to vector<16x32xf32>
    %41 = arith.mulf %38, %40 : vector<16x32xf32>
    %42 = vector.shape_cast %3 : vector<32xf32> to vector<1x32xf32>
    %43 = vector.broadcast %42 : vector<1x32xf32> to vector<16x32xf32>
    %44 = arith.addf %41, %43 : vector<16x32xf32>
    %c0_19 = arith.constant 0 : index
    %c0_20 = arith.constant 0 : index
    %45 = vector.load %arg1[%c0_19, %c0_20] : memref<32x64xf32, #tpu.memory_space<vmem>>, vector<32x64xf32>
    %cst_21 = arith.constant dense<0.000000e+00> : vector<16x64xf32>
    %46 = tpu.matmul %44, %45, %cst_21 {dimension_numbers = #tpu.dot_dimension_numbers<[1], [0], [0], [1], [0, 0, 1, 1], [], []>, precision = #tpu.contract_precision<fp32>} : vector<16x32xf32>, vector<32x64xf32>, vector<16x64xf32> -> vector<16x64xf32>
    %47 = vector.shape_cast %46 : vector<16x64xf32> to vector<2x8x64xf32>
    %48 = vector.extract_strided_slice %47 {offsets = [0, 0, 0], sizes = [2, 8, 4], strides = [1, 1, 1]} : vector<2x8x64xf32> to vector<2x8x4xf32>
    %49 = vector.extract_strided_slice %47 {offsets = [0, 0, 16], sizes = [2, 8, 4], strides = [1, 1, 1]} : vector<2x8x64xf32> to vector<2x8x4xf32>
    %50 = vector.extract_strided_slice %47 {offsets = [0, 0, 32], sizes = [2, 8, 8], strides = [1, 1, 1]} : vector<2x8x64xf32> to vector<2x8x8xf32>
    "tpu.trace_start"() <{level = 10 : i32, message = "btd,bsd->bts"}> : () -> ()
    %cst_22 = arith.constant dense<0.000000e+00> : vector<2x8x8xf32>
    %51 = tpu.matmul %48, %49, %cst_22 {dimension_numbers = #tpu.dot_dimension_numbers<[2], [2], [1], [1], [0, 0, 0, 1, 1, 1], [0], [0]>, precision = #tpu.contract_precision<fp32>} : vector<2x8x4xf32>, vector<2x8x4xf32>, vector<2x8x8xf32> -> vector<2x8x8xf32>
    "tpu.trace_stop"() : () -> ()
    %cst_23 = arith.constant 0.353553385 : f32
    %52 = vector.broadcast %cst_23 : f32 to vector<2x8x8xf32>
    %53 = arith.mulf %51, %52 : vector<2x8x8xf32>
    %cst_24 = arith.constant dense<0xFF800000> : vector<2x8xf32>
    %54 = vector.multi_reduction <maximumf>, %53, %cst_24 [2] : vector<2x8x8xf32> to vector<2x8xf32>
    %55 = vector.shape_cast %54 : vector<2x8xf32> to vector<2x8x1xf32>
    %56 = vector.broadcast %55 : vector<2x8x1xf32> to vector<2x8x8xf32>
    %57 = arith.subf %53, %56 : vector<2x8x8xf32>
    %58 = math.exp %57 : vector<2x8x8xf32>
    %cst_25 = arith.constant dense<0.000000e+00> : vector<2x8xf32>
    %59 = vector.multi_reduction <add>, %58, %cst_25 [2] : vector<2x8x8xf32> to vector<2x8xf32>
    %60 = vector.shape_cast %59 : vector<2x8xf32> to vector<2x8x1xf32>
    %61 = vector.broadcast %60 : vector<2x8x1xf32> to vector<2x8x8xf32>
    %62 = arith.divf %58, %61 : vector<2x8x8xf32>
    "tpu.trace_start"() <{level = 10 : i32, message = "bts,bsd->btd"}> : () -> ()
    %cst_26 = arith.constant dense<0.000000e+00> : vector<2x8x8xf32>
    %63 = tpu.matmul %62, %50, %cst_26 {dimension_numbers = #tpu.dot_dimension_numbers<[2], [1], [1], [2], [0, 0, 0, 1, 1, 2], [0], [0]>, precision = #tpu.contract_precision<fp32>} : vector<2x8x8xf32>, vector<2x8x8xf32>, vector<2x8x8xf32> -> vector<2x8x8xf32>
    "tpu.trace_stop"() : () -> ()
    %64 = vector.extract_strided_slice %47 {offsets = [0, 0, 4], sizes = [2, 8, 4], strides = [1, 1, 1]} : vector<2x8x64xf32> to vector<2x8x4xf32>
    %65 = vector.extract_strided_slice %47 {offsets = [0, 0, 20], sizes = [2, 8, 4], strides = [1, 1, 1]} : vector<2x8x64xf32> to vector<2x8x4xf32>
    %66 = vector.extract_strided_slice %47 {offsets = [0, 0, 40], sizes = [2, 8, 8], strides = [1, 1, 1]} : vector<2x8x64xf32> to vector<2x8x8xf32>
    "tpu.trace_start"() <{level = 10 : i32, message = "btd,bsd->bts"}> : () -> ()
    %cst_27 = arith.constant dense<0.000000e+00> : vector<2x8x8xf32>
    %67 = tpu.matmul %64, %65, %cst_27 {dimension_numbers = #tpu.dot_dimension_numbers<[2], [2], [1], [1], [0, 0, 0, 1, 1, 1], [0], [0]>, precision = #tpu.contract_precision<fp32>} : vector<2x8x4xf32>, vector<2x8x4xf32>, vector<2x8x8xf32> -> vector<2x8x8xf32>
    "tpu.trace_stop"() : () -> ()
    %cst_28 = arith.constant 0.353553385 : f32
    %68 = vector.broadcast %cst_28 : f32 to vector<2x8x8xf32>
    %69 = arith.mulf %67, %68 : vector<2x8x8xf32>
    %cst_29 = arith.constant dense<0xFF800000> : vector<2x8xf32>
    %70 = vector.multi_reduction <maximumf>, %69, %cst_29 [2] : vector<2x8x8xf32> to vector<2x8xf32>
    %71 = vector.shape_cast %70 : vector<2x8xf32> to vector<2x8x1xf32>
    %72 = vector.broadcast %71 : vector<2x8x1xf32> to vector<2x8x8xf32>
    %73 = arith.subf %69, %72 : vector<2x8x8xf32>
    %74 = math.exp %73 : vector<2x8x8xf32>
    %cst_30 = arith.constant dense<0.000000e+00> : vector<2x8xf32>
    %75 = vector.multi_reduction <add>, %74, %cst_30 [2] : vector<2x8x8xf32> to vector<2x8xf32>
    %76 = vector.shape_cast %75 : vector<2x8xf32> to vector<2x8x1xf32>
    %77 = vector.broadcast %76 : vector<2x8x1xf32> to vector<2x8x8xf32>
    %78 = arith.divf %74, %77 : vector<2x8x8xf32>
    "tpu.trace_start"() <{level = 10 : i32, message = "bts,bsd->btd"}> : () -> ()
    %cst_31 = arith.constant dense<0.000000e+00> : vector<2x8x8xf32>
    %79 = tpu.matmul %78, %66, %cst_31 {dimension_numbers = #tpu.dot_dimension_numbers<[2], [1], [1], [2], [0, 0, 0, 1, 1, 2], [0], [0]>, precision = #tpu.contract_precision<fp32>} : vector<2x8x8xf32>, vector<2x8x8xf32>, vector<2x8x8xf32> -> vector<2x8x8xf32>
    "tpu.trace_stop"() : () -> ()
    %80 = vector.extract_strided_slice %47 {offsets = [0, 0, 8], sizes = [2, 8, 4], strides = [1, 1, 1]} : vector<2x8x64xf32> to vector<2x8x4xf32>
    %81 = vector.extract_strided_slice %47 {offsets = [0, 0, 24], sizes = [2, 8, 4], strides = [1, 1, 1]} : vector<2x8x64xf32> to vector<2x8x4xf32>
    %82 = vector.extract_strided_slice %47 {offsets = [0, 0, 48], sizes = [2, 8, 8], strides = [1, 1, 1]} : vector<2x8x64xf32> to vector<2x8x8xf32>
    "tpu.trace_start"() <{level = 10 : i32, message = "btd,bsd->bts"}> : () -> ()
    %cst_32 = arith.constant dense<0.000000e+00> : vector<2x8x8xf32>
    %83 = tpu.matmul %80, %81, %cst_32 {dimension_numbers = #tpu.dot_dimension_numbers<[2], [2], [1], [1], [0, 0, 0, 1, 1, 1], [0], [0]>, precision = #tpu.contract_precision<fp32>} : vector<2x8x4xf32>, vector<2x8x4xf32>, vector<2x8x8xf32> -> vector<2x8x8xf32>
    "tpu.trace_stop"() : () -> ()
    %cst_33 = arith.constant 0.353553385 : f32
    %84 = vector.broadcast %cst_33 : f32 to vector<2x8x8xf32>
    %85 = arith.mulf %83, %84 : vector<2x8x8xf32>
    %cst_34 = arith.constant dense<0xFF800000> : vector<2x8xf32>
    %86 = vector.multi_reduction <maximumf>, %85, %cst_34 [2] : vector<2x8x8xf32> to vector<2x8xf32>
    %87 = vector.shape_cast %86 : vector<2x8xf32> to vector<2x8x1xf32>
    %88 = vector.broadcast %87 : vector<2x8x1xf32> to vector<2x8x8xf32>
    %89 = arith.subf %85, %88 : vector<2x8x8xf32>
    %90 = math.exp %89 : vector<2x8x8xf32>
    %cst_35 = arith.constant dense<0.000000e+00> : vector<2x8xf32>
    %91 = vector.multi_reduction <add>, %90, %cst_35 [2] : vector<2x8x8xf32> to vector<2x8xf32>
    %92 = vector.shape_cast %91 : vector<2x8xf32> to vector<2x8x1xf32>
    %93 = vector.broadcast %92 : vector<2x8x1xf32> to vector<2x8x8xf32>
    %94 = arith.divf %90, %93 : vector<2x8x8xf32>
    "tpu.trace_start"() <{level = 10 : i32, message = "bts,bsd->btd"}> : () -> ()
    %cst_36 = arith.constant dense<0.000000e+00> : vector<2x8x8xf32>
    %95 = tpu.matmul %94, %82, %cst_36 {dimension_numbers = #tpu.dot_dimension_numbers<[2], [1], [1], [2], [0, 0, 0, 1, 1, 2], [0], [0]>, precision = #tpu.contract_precision<fp32>} : vector<2x8x8xf32>, vector<2x8x8xf32>, vector<2x8x8xf32> -> vector<2x8x8xf32>
    "tpu.trace_stop"() : () -> ()
    %96 = vector.extract_strided_slice %47 {offsets = [0, 0, 12], sizes = [2, 8, 4], strides = [1, 1, 1]} : vector<2x8x64xf32> to vector<2x8x4xf32>
    %97 = vector.extract_strided_slice %47 {offsets = [0, 0, 28], sizes = [2, 8, 4], strides = [1, 1, 1]} : vector<2x8x64xf32> to vector<2x8x4xf32>
    %98 = vector.extract_strided_slice %47 {offsets = [0, 0, 56], sizes = [2, 8, 8], strides = [1, 1, 1]} : vector<2x8x64xf32> to vector<2x8x8xf32>
    "tpu.trace_start"() <{level = 10 : i32, message = "btd,bsd->bts"}> : () -> ()
    %cst_37 = arith.constant dense<0.000000e+00> : vector<2x8x8xf32>
    %99 = tpu.matmul %96, %97, %cst_37 {dimension_numbers = #tpu.dot_dimension_numbers<[2], [2], [1], [1], [0, 0, 0, 1, 1, 1], [0], [0]>, precision = #tpu.contract_precision<fp32>} : vector<2x8x4xf32>, vector<2x8x4xf32>, vector<2x8x8xf32> -> vector<2x8x8xf32>
    "tpu.trace_stop"() : () -> ()
    %cst_38 = arith.constant 0.353553385 : f32
    %100 = vector.broadcast %cst_38 : f32 to vector<2x8x8xf32>
    %101 = arith.mulf %99, %100 : vector<2x8x8xf32>
    %cst_39 = arith.constant dense<0xFF800000> : vector<2x8xf32>
    %102 = vector.multi_reduction <maximumf>, %101, %cst_39 [2] : vector<2x8x8xf32> to vector<2x8xf32>
    %103 = vector.shape_cast %102 : vector<2x8xf32> to vector<2x8x1xf32>
    %104 = vector.broadcast %103 : vector<2x8x1xf32> to vector<2x8x8xf32>
    %105 = arith.subf %101, %104 : vector<2x8x8xf32>
    %106 = math.exp %105 : vector<2x8x8xf32>
    %cst_40 = arith.constant dense<0.000000e+00> : vector<2x8xf32>
    %107 = vector.multi_reduction <add>, %106, %cst_40 [2] : vector<2x8x8xf32> to vector<2x8xf32>
    %108 = vector.shape_cast %107 : vector<2x8xf32> to vector<2x8x1xf32>
    %109 = vector.broadcast %108 : vector<2x8x1xf32> to vector<2x8x8xf32>
    %110 = arith.divf %106, %109 : vector<2x8x8xf32>
    "tpu.trace_start"() <{level = 10 : i32, message = "bts,bsd->btd"}> : () -> ()
    %cst_41 = arith.constant dense<0.000000e+00> : vector<2x8x8xf32>
    %111 = tpu.matmul %110, %98, %cst_41 {dimension_numbers = #tpu.dot_dimension_numbers<[2], [1], [1], [2], [0, 0, 0, 1, 1, 2], [0], [0]>, precision = #tpu.contract_precision<fp32>} : vector<2x8x8xf32>, vector<2x8x8xf32>, vector<2x8x8xf32> -> vector<2x8x8xf32>
    "tpu.trace_stop"() : () -> ()
    %112 = tpu.concatenate %63, %79, %95, %111 in 2 : vector<2x8x8xf32>, vector<2x8x8xf32>, vector<2x8x8xf32>, vector<2x8x8xf32> -> vector<2x8x32xf32>
    %113 = vector.shape_cast %112 : vector<2x8x32xf32> to vector<16x32xf32>
    %114 = arith.addf %20, %113 : vector<16x32xf32>
    %cst_42 = arith.constant dense<0.000000e+00> : vector<16xf32>
    %115 = vector.multi_reduction <add>, %114, %cst_42 [1] : vector<16x32xf32> to vector<16xf32>
    %116 = vector.shape_cast %115 : vector<16xf32> to vector<16x1xf32>
    %cst_43 = arith.constant 3.200000e+01 : f32
    %117 = vector.broadcast %cst_43 : f32 to vector<16x1xf32>
    %118 = arith.divf %116, %117 : vector<16x1xf32>
    %119 = vector.broadcast %118 : vector<16x1xf32> to vector<16x32xf32>
    %120 = arith.subf %114, %119 : vector<16x32xf32>
    %121 = arith.mulf %120, %120 : vector<16x32xf32>
    %cst_44 = arith.constant dense<0.000000e+00> : vector<16xf32>
    %122 = vector.multi_reduction <add>, %121, %cst_44 [1] : vector<16x32xf32> to vector<16xf32>
    %123 = vector.shape_cast %122 : vector<16xf32> to vector<16x1xf32>
    %cst_45 = arith.constant 3.200000e+01 : f32
    %124 = vector.broadcast %cst_45 : f32 to vector<16x1xf32>
    %125 = arith.divf %123, %124 : vector<16x1xf32>
    %126 = vector.broadcast %118 : vector<16x1xf32> to vector<16x32xf32>
    %127 = arith.subf %114, %126 : vector<16x32xf32>
    %cst_46 = arith.constant 9.99999974E-6 : f32
    %128 = vector.broadcast %cst_46 : f32 to vector<16x1xf32>
    %129 = arith.addf %125, %128 : vector<16x1xf32>
    %130 = math.rsqrt %129 : vector<16x1xf32>
    %131 = vector.broadcast %130 : vector<16x1xf32> to vector<16x32xf32>
    %132 = arith.mulf %127, %131 : vector<16x32xf32>
    %133 = vector.shape_cast %5 : vector<32xf32> to vector<1x32xf32>
    %134 = vector.broadcast %133 : vector<1x32xf32> to vector<16x32xf32>
    %135 = arith.mulf %132, %134 : vector<16x32xf32>
    %136 = vector.shape_cast %7 : vector<32xf32> to vector<1x32xf32>
    %137 = vector.broadcast %136 : vector<1x32xf32> to vector<16x32xf32>
    %138 = arith.addf %135, %137 : vector<16x32xf32>
    %c0_47 = arith.constant 0 : index
    %c0_48 = arith.constant 0 : index
    %139 = vector.load %arg2[%c0_47, %c0_48] : memref<32x64xf32, #tpu.memory_space<vmem>>, vector<32x64xf32>
    %cst_49 = arith.constant dense<0.000000e+00> : vector<16x64xf32>
    %140 = tpu.matmul %138, %139, %cst_49 {dimension_numbers = #tpu.dot_dimension_numbers<[1], [0], [0], [1], [0, 0, 1, 1], [], []>, precision = #tpu.contract_precision<fp32>} : vector<16x32xf32>, vector<32x64xf32>, vector<16x64xf32> -> vector<16x64xf32>
    %141 = vector.shape_cast %19 : vector<64xf32> to vector<1x64xf32>
    %142 = vector.broadcast %141 : vector<1x64xf32> to vector<16x64xf32>
    %143 = arith.addf %140, %142 : vector<16x64xf32>
    %cst_50 = arith.constant dense<0.000000e+00> : vector<16xf32>
    %144 = vector.multi_reduction <add>, %143, %cst_50 [1] : vector<16x64xf32> to vector<16xf32>
    %145 = vector.shape_cast %144 : vector<16xf32> to vector<16x1xf32>
    %cst_51 = arith.constant 6.400000e+01 : f32
    %146 = vector.broadcast %cst_51 : f32 to vector<16x1xf32>
    %147 = arith.divf %145, %146 : vector<16x1xf32>
    %148 = vector.broadcast %147 : vector<16x1xf32> to vector<16x64xf32>
    %149 = arith.subf %143, %148 : vector<16x64xf32>
    %150 = arith.mulf %149, %149 : vector<16x64xf32>
    %cst_52 = arith.constant dense<0.000000e+00> : vector<16xf32>
    %151 = vector.multi_reduction <add>, %150, %cst_52 [1] : vector<16x64xf32> to vector<16xf32>
    %152 = vector.shape_cast %151 : vector<16xf32> to vector<16x1xf32>
    %cst_53 = arith.constant 6.400000e+01 : f32
    %153 = vector.broadcast %cst_53 : f32 to vector<16x1xf32>
    %154 = arith.divf %152, %153 : vector<16x1xf32>
    %155 = vector.broadcast %147 : vector<16x1xf32> to vector<16x64xf32>
    %156 = arith.subf %143, %155 : vector<16x64xf32>
    %cst_54 = arith.constant 9.99999974E-6 : f32
    %157 = vector.broadcast %cst_54 : f32 to vector<16x1xf32>
    %158 = arith.addf %154, %157 : vector<16x1xf32>
    %159 = math.rsqrt %158 : vector<16x1xf32>
    %160 = vector.broadcast %159 : vector<16x1xf32> to vector<16x64xf32>
    %161 = arith.mulf %156, %160 : vector<16x64xf32>
    %162 = vector.shape_cast %15 : vector<64xf32> to vector<1x64xf32>
    %163 = vector.broadcast %162 : vector<1x64xf32> to vector<16x64xf32>
    %164 = arith.mulf %161, %163 : vector<16x64xf32>
    %165 = vector.shape_cast %17 : vector<64xf32> to vector<1x64xf32>
    %166 = vector.broadcast %165 : vector<1x64xf32> to vector<16x64xf32>
    %167 = arith.addf %164, %166 : vector<16x64xf32>
    %cst_55 = arith.constant 0.000000e+00 : f32
    %168 = vector.broadcast %cst_55 : f32 to vector<16x64xf32>
    %169 = arith.maximumf %167, %168 : vector<16x64xf32>
    %c0_56 = arith.constant 0 : index
    %c0_57 = arith.constant 0 : index
    %170 = vector.load %arg3[%c0_56, %c0_57] : memref<64x32xf32, #tpu.memory_space<vmem>>, vector<64x32xf32>
    %cst_58 = arith.constant dense<0.000000e+00> : vector<16x32xf32>
    %171 = tpu.matmul %169, %170, %cst_58 {dimension_numbers = #tpu.dot_dimension_numbers<[1], [0], [0], [1], [0, 0, 1, 1], [], []>, precision = #tpu.contract_precision<fp32>} : vector<16x64xf32>, vector<64x32xf32>, vector<16x32xf32> -> vector<16x32xf32>
    %172 = vector.shape_cast %13 : vector<32xf32> to vector<1x32xf32>
    %173 = vector.broadcast %172 : vector<1x32xf32> to vector<16x32xf32>
    %174 = arith.addf %171, %173 : vector<16x32xf32>
    %cst_59 = arith.constant dense<0.000000e+00> : vector<16xf32>
    %175 = vector.multi_reduction <add>, %174, %cst_59 [1] : vector<16x32xf32> to vector<16xf32>
    %176 = vector.shape_cast %175 : vector<16xf32> to vector<16x1xf32>
    %cst_60 = arith.constant 3.200000e+01 : f32
    %177 = vector.broadcast %cst_60 : f32 to vector<16x1xf32>
    %178 = arith.divf %176, %177 : vector<16x1xf32>
    %179 = vector.broadcast %178 : vector<16x1xf32> to vector<16x32xf32>
    %180 = arith.subf %174, %179 : vector<16x32xf32>
    %181 = arith.mulf %180, %180 : vector<16x32xf32>
    %cst_61 = arith.constant dense<0.000000e+00> : vector<16xf32>
    %182 = vector.multi_reduction <add>, %181, %cst_61 [1] : vector<16x32xf32> to vector<16xf32>
    %183 = vector.shape_cast %182 : vector<16xf32> to vector<16x1xf32>
    %cst_62 = arith.constant 3.200000e+01 : f32
    %184 = vector.broadcast %cst_62 : f32 to vector<16x1xf32>
    %185 = arith.divf %183, %184 : vector<16x1xf32>
    %186 = vector.broadcast %178 : vector<16x1xf32> to vector<16x32xf32>
    %187 = arith.subf %174, %186 : vector<16x32xf32>
    %cst_63 = arith.constant 9.99999974E-6 : f32
    %188 = vector.broadcast %cst_63 : f32 to vector<16x1xf32>
    %189 = arith.addf %185, %188 : vector<16x1xf32>
    %190 = math.rsqrt %189 : vector<16x1xf32>
    %191 = vector.broadcast %190 : vector<16x1xf32> to vector<16x32xf32>
    %192 = arith.mulf %187, %191 : vector<16x32xf32>
    %193 = vector.shape_cast %9 : vector<32xf32> to vector<1x32xf32>
    %194 = vector.broadcast %193 : vector<1x32xf32> to vector<16x32xf32>
    %195 = arith.mulf %192, %194 : vector<16x32xf32>
    %196 = vector.shape_cast %11 : vector<32xf32> to vector<1x32xf32>
    %197 = vector.broadcast %196 : vector<1x32xf32> to vector<16x32xf32>
    %198 = arith.addf %195, %197 : vector<16x32xf32>
    %199 = arith.addf %114, %198 : vector<16x32xf32>
    %c0_64 = arith.constant 0 : index
    %c0_65 = arith.constant 0 : index
    %200 = vector.load %arg6[%c0_64, %c0_65] : memref<16x32xf32, #tpu.memory_space<vmem>>, vector<16x32xf32>
    tpu.vector_store %arg6[%c0_64, %c0_65], %199 {strides = array<i32>} : memref<16x32xf32, #tpu.memory_space<vmem>>, vector<16x32xf32>,
    return
  }
}

</mosaic_0001>

<bundles_post_ra>
// kernel: tpu_custom_call.1
= control target key start
LH: loop header
LB: loop body
LE: loop exit
PB: predicated region body
PF: predicated region fallthrough
CT: control target
= control target key end

     0   :  { %vm36_vm0 = vcmask 261120   ;;  %s11577_s0 = inlined_call_operand.vmem [shape: f32[16,32], index: 0, kind: input, shape index: {}]   ;;  %s11578_s1 = inlined_call_operand.vmem [shape: f32[32,64], index: 1, kind: input, shape index: {}]   ;;  %s11579_s2 = inlined_call_operand.vmem [shape: f32[32,64], index: 2, kind: input, shape index: {}]   ;;  %s11580_s3 = inlined_call_operand.vmem [shape: f32[64,32], index: 3, kind: input, shape index: {}]   ;;  %s11581_s4 = inlined_call_operand.vmem [shape: f32[7,32], index: 4, kind: input, shape index: {}]   ;;  %s11582_s5 = inlined_call_operand.vmem [shape: f32[3,64], index: 5, kind: input, shape index: {}]   ;;  %s11583_s6 = inlined_call_operand.hbm [shape: f32[16,32], index: 6, kind: output, shape index: {}]  }
   0x1   :  { %v34_v0 = vld [vmem:[%s11577_s0] sm:$0xff]  ;;  %v35_v1 = vld [vmem:[%s11577_s0 + $0x8] sm:$0xff] }
   0x2   :  { %11 = vsyncpa [#allocation3], 0  ;;  %v37_v2 = vsel %vm36_vm0, %v34_v0, 0.0  ;;  %v40_v3 = vsel %vm36_vm0, %v35_v1, 0.0  ;;  %v76_v14 = vld [vmem:[%s11578_s1] sm:$0xff]  ;;  %v77_v15 = vld [vmem:[%s11578_s1 + $0x8] sm:$0xff] }
   0x3   :  { %38 = vadd.xlane.f32.xlu0 %v37_v2  ;;  %v78_v16 = vld [vmem:[%s11578_s1 + $0x10] sm:$0xff]  ;;  %v87_v17 = vand.u32 4294901760, %v76_v14  ;;  %v90_v18 = vand.u32 4294901760, %v77_v15  ;;  %v79_v19 = vld [vmem:[%s11578_s1 + $0x18] sm:$0xff]  ;;  %v9270_v53 = vld [vmem:[%s11581_s4] ss:$0 sm:$0xff] }
   0x4   :  { %v93_v20 = vand.u32 4294901760, %v78_v16  ;;  %v96_v21 = vand.u32 4294901760, %v79_v19  ;;  %v9271_v55 = vld [vmem:[%s11581_s4 + $0x1] ss:$0 sm:$0xff]  ;;  %vm10808_vm1 = vmmov 0   ;;  %s10809_s12 = smov 112  }
   0x5   :  { %v10882_v22 = vpack.c.bf16 %v90_v18, %v87_v17  ;;  %v177_v24 = vsub.f32 %v76_v14, %v87_v17  ;;  %v184_v25 = vsub.f32 %v77_v15, %v90_v18  ;;  %vm617_vm2 = vcmask 31744   ;;  %s10810_s13 = smov 96   ;;  %s10811_s14 = smov 108  }
   0x6   :  { %v10884_v23 = vpack.c.bf16 %v96_v21, %v93_v20  ;;  %v191_v30 = vsub.f32 %v78_v16, %v93_v20  ;;  %v198_v31 = vsub.f32 %v79_v19, %v96_v21  ;;  %vm1523_vm3 = vcmask 64512   ;;  %s10812_s15 = smov 124   ;;  %s10813_s16 = smov 88  }
   0x7   :  { %41 = vadd.xlane.f32.xlu0 %v40_v3  ;;  %10331 = vmatprep.subr.bf16.mxu0 %v10882_v22  ;;  %v178_v26 = vand.u32 4294901760, %v177_v24  ;;  %v185_v27 = vand.u32 4294901760, %v184_v25  ;;  %v10346_v42 = vpack.c.bf16 %v184_v25, %v177_v24  ;;  %s10814_s17 = smov 120   ;;  %s10815_s18 = smov 104   ;;  %vm7987_vm4 = vcmask 195584  }
   0x8   :  { %10333 = vmatpush3.bf16.msra.mxu0 %v10882_v22  ;;  %v192_v34 = vand.u32 4294901760, %v191_v30  ;;  %v199_v35 = vand.u32 4294901760, %v198_v31  ;;  %v10350_v43 = vpack.c.bf16 %v198_v31, %v191_v30  ;;  %s10816_s19 = smov 80   ;;  %s10817_s20 = smov 116   ;;  %vm7984_vm5 = vcmask 130048  }
   0x9   :  { %10335 = vmatprep.subr.bf16.mxu0 %v10884_v23  ;;  %v179_v28 = vsub.f32 %v177_v24, %v178_v26  ;;  %v186_v29 = vsub.f32 %v184_v25, %v185_v27  ;;  %v10362_v44 = vpack.c.bf16 %v185_v27, %v178_v26  ;;  %s10818_s21 = smov 100   ;;  %s10819_s22 = smov 72   ;;  %vm8572_vm6 = vcmask 523264  }
   0xa   :  { %v193_v37 = vsub.f32 %v191_v30, %v192_v34  ;;  %v200_v38 = vsub.f32 %v198_v31, %v199_v35  ;;  %v10366_v45 = vpack.c.bf16 %v199_v35, %v192_v34  ;;  %s10820_s23 = smov 8   ;;  %s10821_s24 = smov 16  }
   0xb   :  { %v180_v32 = vand.u32 4294901760, %v179_v28  ;;  %v187_v33 = vand.u32 4294901760, %v186_v29  ;;  %s10822_s25 = smov 24  }
   0xc   :  { %10337 = vmatpush3.bf16.msra.mxu0 %v10884_v23  ;;  %v194_v39 = vand.u32 4294901760, %v193_v37  ;;  %v201_v40 = vand.u32 4294901760, %v200_v38 }
   0xd   :  { %v10338_v36 = vpack.c.bf16 %v187_v33, %v180_v32 }
   0xe   :  { %v10342_v41 = vpack.c.bf16 %v201_v40, %v194_v39 }
   0xf   :  { %10339 = vmatprep.subr.bf16.mxu0 %v10338_v36 }
  0x90   :  { %v39_v4 = vpop.xlane.xlu0 %38 }
  0x91   :  { %v44_v5 = vmul.f32 0.03125, %v39_v4 }
  0x93   :  { %v46_v6 = vsub.f32 %v34_v0, %v44_v5 }
  0x94   :  { %v42_v7 = vpop.xlane.xlu0 %41 }
  0x95   :  { %v45_v8 = vmul.f32 0.03125, %v42_v7  ;;  %v48_v9 = vmul.f32 %v46_v6, %v46_v6 }
  0x97   :  { %v47_v10 = vsub.f32 %v35_v1, %v45_v8  ;;  %v50_v11 = vsel %vm36_vm0, %v48_v9, 0.0 }
  0x98   :  { %51 = vadd.xlane.f32.xlu1 %v50_v11 }
  0x99   :  { %v49_v12 = vmul.f32 %v47_v10, %v47_v10 }
  0x9b   :  { %v53_v13 = vsel %vm36_vm0, %v49_v12, 0.0 }
  0x9c   :  { %54 = vadd.xlane.f32.xlu1 %v53_v13 }
 0x125   :  { %v52_v46 = vpop.xlane.xlu1 %51 }
 0x126   :  { %v56_v47 = vmul.f32 0.03125, %v52_v46 }
 0x128   :  { %v58_v48 = vadd.f32 1e-05, %v56_v47 }
 0x129   :  { %v55_v49 = vpop.xlane.xlu1 %54 }
 0x12a   :  { %10733 = vrsqrt.f32 %v58_v48  ;;  %v57_v50 = vmul.f32 0.03125, %v55_v49 }
 0x12c   :  { %v59_v51 = vadd.f32 1e-05, %v57_v50 }
 0x12e   :  { %10735 = vrsqrt.f32 %v59_v51 }
 0x134   :  { %v10734_v52 = vpop.eup %10733 }
 0x135   :  { %v62_v54 = vmul.f32 %v10734_v52, %v46_v6 }
 0x137   :  { %v68_v56 = vmul.f32 %v9270_v53, %v62_v54 }
 0x138   :  { %v10736_v57 = vpop.eup %10735 }
 0x139   :  { %v63_v58 = vmul.f32 %v10736_v57, %v47_v10  ;;  %v74_v59 = vadd.f32 %v9271_v55, %v68_v56  ;;  %v10807_v10 = vmov 0.0  }
 0x13a   :  { %9680 = vmatprep.subr.mxu1 %v10807_v10  ;;  %9682 = vmatprep.mubr.msk.f32.mxu1 %vm10808_vm1, %v10807_v10 }
 0x13b   :  { %v69_v60 = vmul.f32 %v9270_v53, %v63_v58  ;;  %v81_v61 = vsel %vm36_vm0, %v74_v59, 0 }
 0x13c   :  { %v155_v62 = vand.u32 4294901760, %v81_v61 }
 0x13d   :  { %v75_v63 = vadd.f32 %v9271_v55, %v69_v60 }
 0x13e   :  { %v156_v0 = vsub.f32 %v81_v61, %v155_v62 }
 0x13f   :  { %v84_v1 = vsel %vm36_vm0, %v75_v63, 0 }
 0x140   :  { %v157_v2 = vand.u32 4294901760, %v156_v0  ;;  %v165_v3 = vand.u32 4294901760, %v84_v1 }
 0x142   :  { %v158_v4 = vsub.f32 %v156_v0, %v157_v2  ;;  %v166_v5 = vsub.f32 %v84_v1, %v165_v3 }
 0x144   :  { %v159_v6 = vand.u32 4294901760, %v158_v4  ;;  %v167_v7 = vand.u32 4294901760, %v166_v5 }
 0x146   :  { %9612 = vmatprep.mubr.f32.mxu0 %v159_v6  ;;  %v168_v8 = vsub.f32 %v166_v5, %v167_v7 }
 0x148   :  { %v169_v9 = vand.u32 4294901760, %v168_v8 }
 0x14a   :  { %9613 = vmatmul.mubr.f32.vlgmr.msra.gmra.mrb[0].mxu0 %v169_v9 }
 0x14b   :  { %10341 = vmatpush3.bf16.msra.mxu0 %v10338_v36  ;;  %9623 = vmatprep.mubr.f32.mxu0 %v155_v62 }
 0x14c   :  { %10343 = vmatprep.subr.bf16.mxu0 %v10342_v41 }
 0x14f   :  { %10345 = vmatpush3.bf16.msra.mxu0 %v10342_v41 }
 0x150   :  { %10347 = vmatprep.subr.bf16.mxu0 %v10346_v42 }
 0x152   :  { %9624 = vmatmul.mubr.f32.vlgmr.msra.gmra.mrb[0].mxu0 %v165_v3 }
 0x153   :  { %10349 = vmatpush3.bf16.msra.mxu0 %v10346_v42  ;;  %9634 = vmatprep.mubr.f32.mxu0 %v156_v0 }
 0x154   :  { %10351 = vmatprep.subr.bf16.mxu0 %v10350_v43 }
 0x157   :  { %10353 = vmatpush3.bf16.msra.mxu0 %v10350_v43 }
 0x158   :  { %10355 = vmatprep.subr.bf16.mxu0 %v10882_v22 }
 0x15a   :  { %9635 = vmatmul.mubr.f32.vlgmr.msra.gmra.mrb[0].mxu0 %v166_v5 }
 0x15b   :  { %10357 = vmatpush3.bf16.msra.mxu0 %v10882_v22  ;;  %9645 = vmatprep.mubr.f32.mxu0 %v157_v2 }
 0x15c   :  { %10359 = vmatprep.subr.bf16.mxu0 %v10884_v23 }
 0x15f   :  { %10361 = vmatpush3.bf16.msra.mxu0 %v10884_v23 }
 0x160   :  { %10363 = vmatprep.subr.bf16.mxu0 %v10362_v44 }
 0x162   :  { %9646 = vmatmul.mubr.f32.vlgmr.msra.gmra.mrb[0].mxu0 %v167_v7 }
 0x163   :  { %10365 = vmatpush3.bf16.msra.mxu0 %v10362_v44  ;;  %9656 = vmatprep.mubr.f32.mxu0 %v155_v62 }
 0x164   :  { %10367 = vmatprep.subr.bf16.mxu0 %v10366_v45 }
 0x167   :  { %10369 = vmatpush3.bf16.msra.mxu0 %v10366_v45 }
 0x168   :  { %10371 = vmatprep.subr.bf16.mxu0 %v10882_v22 }
 0x16a   :  { %9657 = vmatmul.mubr.f32.vlgmr.msra.gmra.mrb[0].mxu0 %v165_v3 }
 0x16b   :  { %10373 = vmatpush3.bf16.msra.mxu0 %v10882_v22  ;;  %9667 = vmatprep.mubr.f32.mxu0 %v155_v62 }
 0x16c   :  { %10375 = vmatprep.subr.bf16.mxu0 %v10884_v23 }
 0x16f   :  { %10377 = vmatpush3.bf16.msra.mxu0 %v10884_v23 }
 0x170   :  { %9670 = vmatprep.subr.mxu0 %v10807_v10 }
 0x172   :  { %9668 = vmatmul.mubr.f32.vlgmr.msra.gmra.mrb[0].mxu0 %v165_v3 }
 0x173   :  { %9672 = vmatprep.mubr.msk.f32.mxu0 %vm10808_vm1, %v10807_v10 }
 0x245   :  { %v10912_v11 = vpop.f32.mrb[0].mxu0 }
 0x246   :  { %1069 = vrot.lane.b32.xlu1 %v10912_v11, %s10809_s12  ;;  %v10915_v12 = vpop.f32.mrb[1].mxu0  ;;  %v1071_v27 = vsel %vm617_vm2, %v10912_v11, 0 }
 0x247   :  { %615 = vrot.lane.b32.xlu0 %v10915_v12, %s10809_s12  ;;  %v618_v13 = vsel %vm617_vm2, %v10915_v12, 0  ;;  %v1141_v29 = vand.u32 4294901760, %v1071_v27 }
 0x248   :  { %v688_v14 = vand.u32 4294901760, %v618_v13 }
 0x249   :  { %v1142_v31 = vsub.f32 %v1071_v27, %v1141_v29 }
 0x24a   :  { %v689_v15 = vsub.f32 %v618_v13, %v688_v14 }
 0x24b   :  { %v1143_v33 = vand.u32 4294901760, %v1142_v31 }
 0x24c   :  { %v690_v16 = vand.u32 4294901760, %v689_v15 }
 0x24d   :  { %v1144_v35 = vsub.f32 %v1142_v31, %v1143_v33 }
 0x24e   :  { %v691_v19 = vsub.f32 %v689_v15, %v690_v16 }
 0x24f   :  { %v1145_v37 = vand.u32 4294901760, %v1144_v35 }
 0x250   :  { %v692_v22 = vand.u32 4294901760, %v691_v19 }
 0x2b8   :  { %v1070_v26 = vpop.permute.xlu1 %1069 }
 0x2b9   :  { %v616_v17 = vpop.permute.xlu0 %615  ;;  %v1073_v28 = vsel %vm617_vm2, %v1070_v26, 0 }
 0x2ba   :  { %v620_v18 = vsel %vm617_vm2, %v616_v17, 0  ;;  %v1076_v30 = vand.u32 4294901760, %v1073_v28 }
 0x2bb   :  { %v623_v20 = vand.u32 4294901760, %v620_v18 }
 0x2bc   :  { %v1153_v32 = vsub.f32 %v1073_v28, %v1076_v30 }
 0x2bd   :  { %v700_v21 = vsub.f32 %v620_v18, %v623_v20  ;;  %9671 = vmatpush3.xpose.msra.mxu0 %v623_v20 }
 0x2be   :  { %9675 = vmatprep.subr.mxu0 %v10807_v10  ;;  %v1154_v34 = vand.u32 4294901760, %v1153_v32 }
 0x2bf   :  { %v701_v23 = vand.u32 4294901760, %v700_v21  ;;  %9681 = vmatpush3.xpose.msra.mxu1 %v700_v21 }
 0x2c0   :  { %9673 = vmatmul.mubr.f32.vlgmr.msra.gmra.mrb[2].mxu0 %v692_v22  ;;  %9685 = vmatprep.subr.mxu1 %v10807_v10  ;;  %v1155_v36 = vsub.f32 %v1153_v32, %v1154_v34 }
 0x2c1   :  { %v702_v24 = vsub.f32 %v700_v21, %v701_v23  ;;  %9677 = vmatprep.mubr.msk.f32.mxu0 %vm10808_vm1, %v10807_v10 }
 0x2c2   :  { %9683 = vmatmul.mubr.f32.vlgmr.msra.gmra.mrb[0].mxu1 %v689_v15  ;;  %v1156_v38 = vand.u32 4294901760, %v1155_v36 }
 0x2c3   :  { %v703_v25 = vand.u32 4294901760, %v702_v24  ;;  %9686 = vmatpush3.xpose.msra.mxu1 %v623_v20  ;;  %9687 = vmatprep.mubr.msk.f32.mxu1 %vm10808_vm1, %v10807_v10 }
 0x2c4   :  { %9690 = vmatprep.subr.mxu1 %v10807_v10 }
 0x2c5   :  { %9676 = vmatpush3.xpose.msra.mxu0 %v703_v25 }
 0x2c6   :  { %9730 = vmatprep.subr.mxu0 %v10807_v10 }
 0x2c8   :  { %9678 = vmatmul.mubr.f32.vlgmr.msra.gmra.mrb[2].mxu0 %v688_v14 }
 0x2c9   :  { %9732 = vmatprep.mubr.msk.f32.mxu0 %vm10808_vm1, %v10807_v10 }
 0x2ca   :  { %9688 = vmatmul.mubr.f32.vlgmr.msra.gmra.mrb[0].mxu1 %v690_v16 }
 0x2cb   :  { %9691 = vmatpush3.xpose.msra.mxu1 %v701_v23  ;;  %9692 = vmatprep.mubr.msk.f32.mxu1 %vm10808_vm1, %v10807_v10 }
 0x2cc   :  { %9695 = vmatprep.subr.mxu1 %v10807_v10 }
 0x2d2   :  { %9693 = vmatmul.mubr.f32.vlgmr.msra.gmra.mrb[0].mxu1 %v688_v14 }
 0x2d3   :  { %9696 = vmatpush3.xpose.msra.mxu1 %v623_v20  ;;  %9697 = vmatprep.mubr.msk.f32.mxu1 %vm10808_vm1, %v10807_v10 }
 0x2d4   :  { %9700 = vmatprep.subr.mxu1 %v10807_v10 }
 0x2da   :  { %9698 = vmatmul.mubr.f32.vlgmr.msra.gmra.mrb[0].mxu1 %v688_v14 }
 0x2db   :  { %9701 = vmatpush3.xpose.msra.mxu1 %v1076_v30  ;;  %9702 = vmatprep.mubr.msk.f32.mxu1 %vm10808_vm1, %v10807_v10 }
 0x2dc   :  { %9705 = vmatprep.subr.mxu1 %v10807_v10 }
 0x2de   :  { %9703 = vmatmul.mubr.f32.vlgmr.msra.gmra.mrb[2].mxu1 %v1145_v37 }
 0x2df   :  { %9706 = vmatpush3.xpose.msra.mxu1 %v1156_v38  ;;  %9707 = vmatprep.mubr.msk.f32.mxu1 %vm10808_vm1, %v10807_v10 }
 0x2e0   :  { %9710 = vmatprep.subr.mxu1 %v10807_v10 }
 0x2e6   :  { %9708 = vmatmul.mubr.f32.vlgmr.msra.gmra.mrb[2].mxu1 %v1141_v29 }
 0x2e7   :  { %9711 = vmatpush3.xpose.msra.mxu1 %v1153_v32  ;;  %9712 = vmatprep.mubr.msk.f32.mxu1 %vm10808_vm1, %v10807_v10 }
 0x2e8   :  { %9715 = vmatprep.subr.mxu1 %v10807_v10 }
 0x2ee   :  { %9713 = vmatmul.mubr.f32.vlgmr.msra.gmra.mrb[2].mxu1 %v1142_v31 }
 0x2ef   :  { %9716 = vmatpush3.xpose.msra.mxu1 %v1076_v30  ;;  %9717 = vmatprep.mubr.msk.f32.mxu1 %vm10808_vm1, %v10807_v10 }
 0x2f0   :  { %9720 = vmatprep.subr.mxu1 %v10807_v10 }
 0x2f6   :  { %9718 = vmatmul.mubr.f32.vlgmr.msra.gmra.mrb[2].mxu1 %v1143_v33 }
 0x2f7   :  { %9721 = vmatpush3.xpose.msra.mxu1 %v1154_v34  ;;  %9722 = vmatprep.mubr.msk.f32.mxu1 %vm10808_vm1, %v10807_v10 }
 0x2f8   :  { %9725 = vmatprep.subr.mxu1 %v10807_v10 }
 0x2fe   :  { %9723 = vmatmul.mubr.f32.vlgmr.msra.gmra.mrb[2].mxu1 %v1141_v29 }
 0x2ff   :  { %9726 = vmatpush3.xpose.msra.mxu1 %v1076_v30  ;;  %9727 = vmatprep.mubr.msk.f32.mxu1 %vm10808_vm1, %v10807_v10 }
 0x300   :  { %9760 = vmatprep.subr.mxu1 %v10807_v10 }
 0x306   :  { %9728 = vmatmul.mubr.f32.vlgmr.msra.gmra.mrb[2].mxu1 %v1141_v29 }
 0x307   :  { %9762 = vmatprep.mubr.msk.f32.mxu1 %vm10808_vm1, %v10807_v10 }
 0x39b   :  { %v770_v39 = vpop.f32.mrb[2].mxu0 }
 0x39c   :  { %v9679_v40 = vpop.f32.mrb[3].mxu0 }
 0x3ad   :  { %v1064_v41 = vpop.f32.mrb[0].mxu1 }
 0x3ae   :  { %v10522_v42 = vadd.f32 %v1064_v41, %v770_v39  ;;  %v9699_v43 = vpop.f32.mrb[1].mxu1 }
 0x3b0   :  { %v1521_v44 = vmul.f32 0.35355338, %v10522_v42 }
 0x3b2   :  { %v1524_v45 = vsel %vm1523_vm3, %v1521_v44, -inf }
 0x3b3   :  { %1525 = vmax.xlane.f32.xlu1 %v1524_v45 }
 0x3d9   :  { %v1517_v46 = vpop.f32.mrb[2].mxu1 }
 0x3da   :  { %v1522_v47 = vmul.f32 0.35355338, %v1517_v46  ;;  %v9729_v48 = vpop.f32.mrb[3].mxu1 }
 0x3dc   :  { %v1527_v49 = vsel %vm1523_vm3, %v1522_v47, -inf }
 0x3dd   :  { %1528 = vmax.xlane.f32.xlu0 %v1527_v49 }
 0x440   :  { %v1526_v50 = vpop.xlane.xlu1 %1525 }
 0x441   :  { %v1530_v51 = vsub.f32 %v1521_v44, %v1526_v50 }
 0x443   :  { %v1532_v52 = vmul.f32 1.442695, %v1530_v51 }
 0x445   :  { %10737 = vpow2.f32 %v1532_v52 }
 0x44f   :  { %v10738_v53 = vpop.eup %10737 }
 0x450   :  { %v1536_v54 = vsel %vm1523_vm3, %v10738_v53, 0.0 }
 0x451   :  { %1537 = vadd.xlane.f32.xlu0 %v1536_v54 }
 0x467   :  { %1546 = vrot.lane.b32.xlu0 %v10915_v12, %s10810_s13 }
 0x46a   :  { %v1529_v55 = vpop.xlane.xlu0 %1528 }
 0x46b   :  { %v1531_v56 = vsub.f32 %v1522_v47, %v1529_v55  ;;  %2452 = vrot.lane.b32.xlu0 %v10915_v12, %s10811_s14 }
 0x46d   :  { %v1534_v57 = vmul.f32 1.442695, %v1531_v56 }
 0x46f   :  { %10739 = vpow2.f32 %v1534_v57 }
 0x479   :  { %v10740_v58 = vpop.eup %10739 }
 0x47a   :  { %v1539_v59 = vsel %vm1523_vm3, %v10740_v58, 0.0 }
 0x47b   :  { %1540 = vadd.xlane.f32.xlu1 %v1539_v59 }
 0x48c   :  { %1998 = vrot.lane.b32.xlu1 %v10912_v11, %s10810_s13 }
 0x490   :  { %2450 = vrot.lane.b32.xlu1 %v10915_v12, %s10812_s15 }
 0x494   :  { %2904 = vrot.lane.b32.xlu1 %v10912_v11, %s10812_s15  ;;  %s10823_s15 = smov [#allocation2]  }
 0x498   :  { %2906 = vrot.lane.b32.xlu1 %v10912_v11, %s10811_s14 }
 0x4de   :  { %v1538_v60 = vpop.xlane.xlu0 %1537 }
 0x4df   :  { %10741 = vrcp.f32 %v1538_v60 }
 0x4e2   :  { %v1547_v61 = vpop.permute.xlu0 %1546 }
 0x4e3   :  { %v1553_v62 = vand.u32 4294901760, %v1547_v61 }
 0x4e5   :  { %9731 = vmatpush3.msra.mxu0 %v1553_v62  ;;  %v1630_v1 = vsub.f32 %v1547_v61, %v1553_v62 }
 0x4e6   :  { %9735 = vmatprep.subr.mxu0 %v10807_v10  ;;  %v2453_v15 = vpop.permute.xlu0 %2452 }
 0x4e7   :  { %v1631_v4 = vand.u32 4294901760, %v1630_v1  ;;  %v2456_v18 = vsel %vm617_vm2, %v2453_v15, 0 }
 0x4e8   :  { %v10990_v21 = vand.u32 4294901760, %v2456_v18 }
 0x4e9   :  { %v10742_v63 = vpop.eup %10741  ;;  %v1632_v7 = vsub.f32 %v1630_v1, %v1631_v4 }
 0x4ea   :  { %v1543_v0 = vmul.f32 %v10742_v63, %v10738_v53  ;;  %v2536_v27 = vsub.f32 %v2456_v18, %v10990_v21 }
 0x4eb   :  { %v1633_v13 = vand.u32 4294901760, %v1632_v7 }
 0x4ec   :  { %v1550_v2 = vsel %vm1523_vm3, %v1543_v0, 0  ;;  %v2537_v33 = vand.u32 4294901760, %v2536_v27 }
 0x4ed   :  { %v1618_v3 = vand.u32 4294901760, %v1550_v2 }
 0x4ee   :  { %v2538_v38 = vsub.f32 %v2536_v27, %v2537_v33 }
 0x4ef   :  { %v1619_v5 = vsub.f32 %v1550_v2, %v1618_v3 }
 0x4f0   :  { %v2539_v42 = vand.u32 4294901760, %v2538_v38 }
 0x4f1   :  { %v1620_v6 = vand.u32 4294901760, %v1619_v5 }
 0x4f3   :  { %v1621_v8 = vsub.f32 %v1619_v5, %v1620_v6 }
 0x4f5   :  { %v1622_v9 = vand.u32 4294901760, %v1621_v8 }
 0x4f7   :  { %9733 = vmatmul.mubr.f32.vlgmr.msra.gmra.mrb[4].mxu0 %v1622_v9 }
 0x4f8   :  { %9736 = vmatpush3.msra.mxu0 %v1633_v13  ;;  %9737 = vmatprep.mubr.msk.f32.mxu0 %vm10808_vm1, %v10807_v10 }
 0x4f9   :  { %9740 = vmatprep.subr.mxu0 %v10807_v10 }
 0x4ff   :  { %9738 = vmatmul.mubr.f32.vlgmr.msra.gmra.mrb[4].mxu0 %v1618_v3 }
 0x500   :  { %9741 = vmatpush3.msra.mxu0 %v1630_v1  ;;  %9742 = vmatprep.mubr.msk.f32.mxu0 %vm10808_vm1, %v10807_v10 }
 0x501   :  { %9745 = vmatprep.subr.mxu0 %v10807_v10 }
 0x507   :  { %9743 = vmatmul.mubr.f32.vlgmr.msra.gmra.mrb[4].mxu0 %v1619_v5 }
 0x508   :  { %9746 = vmatpush3.msra.mxu0 %v1553_v62  ;;  %v1541_v14 = vpop.xlane.xlu1 %1540  ;;  %9747 = vmatprep.mubr.msk.f32.mxu0 %vm10808_vm1, %v10807_v10 }
 0x509   :  { %10743 = vrcp.f32 %v1541_v14  ;;  %9750 = vmatprep.subr.mxu0 %v10807_v10 }
 0x50c   :  { %v1999_v16 = vpop.permute.xlu1 %1998 }
 0x50d   :  { %v10981_v17 = vand.u32 4294901760, %v1999_v16 }
 0x50f   :  { %9748 = vmatmul.mubr.f32.vlgmr.msra.gmra.mrb[4].mxu0 %v1620_v6  ;;  %9761 = vmatpush3.msra.mxu1 %v10981_v17  ;;  %v2082_v25 = vsub.f32 %v1999_v16, %v10981_v17 }
 0x510   :  { %9751 = vmatpush3.msra.mxu0 %v1631_v4  ;;  %v2451_v19 = vpop.permute.xlu1 %2450  ;;  %9752 = vmatprep.mubr.msk.f32.mxu0 %vm10808_vm1, %v10807_v10 }
 0x511   :  { %v2454_v20 = vsel %vm617_vm2, %v2451_v19, 0  ;;  %9755 = vmatprep.subr.mxu0 %v10807_v10  ;;  %9765 = vmatprep.subr.mxu1 %v10807_v10  ;;  %v2083_v30 = vand.u32 4294901760, %v2082_v25 }
 0x512   :  { %v10992_v22 = vand.u32 4294901760, %v2454_v20 }
 0x513   :  { %v10744_v23 = vpop.eup %10743  ;;  %v2084_v35 = vsub.f32 %v2082_v25, %v2083_v30 }
 0x514   :  { %v1545_v24 = vmul.f32 %v10744_v23, %v10740_v58  ;;  %v2525_v26 = vsub.f32 %v2454_v20, %v10992_v22  ;;  %v2905_v43 = vpop.permute.xlu1 %2904 }
 0x515   :  { %v2085_v40 = vand.u32 4294901760, %v2084_v35  ;;  %v2908_v45 = vsel %vm617_vm2, %v2905_v43, 0 }
 0x516   :  { %v2002_v28 = vsel %vm1523_vm3, %v1545_v24, 0  ;;  %v2526_v31 = vand.u32 4294901760, %v2525_v26  ;;  %v2978_v47 = vand.u32 4294901760, %v2908_v45 }
 0x517   :  { %9753 = vmatmul.mubr.f32.vlgmr.msra.gmra.mrb[4].mxu0 %v1618_v3  ;;  %v10998_v29 = vand.u32 4294901760, %v2002_v28 }
 0x518   :  { %9756 = vmatpush3.msra.mxu0 %v1553_v62  ;;  %9757 = vmatprep.mubr.msk.f32.mxu0 %vm10808_vm1, %v10807_v10  ;;  %v2527_v36 = vsub.f32 %v2525_v26, %v2526_v31  ;;  %v2907_v44 = vpop.permute.xlu1 %2906  ;;  %v2979_v49 = vsub.f32 %v2908_v45, %v2978_v47 }
 0x519   :  { %9790 = vmatprep.subr.mxu0 %v10807_v10  ;;  %v2071_v32 = vsub.f32 %v2002_v28, %v10998_v29  ;;  %v2910_v46 = vsel %vm617_vm2, %v2907_v44, 0 }
 0x51a   :  { %v2528_v41 = vand.u32 4294901760, %v2527_v36  ;;  %v2913_v48 = vand.u32 4294901760, %v2910_v46  ;;  %v2980_v51 = vand.u32 4294901760, %v2979_v49 }
 0x51b   :  { %v2072_v34 = vand.u32 4294901760, %v2071_v32 }
 0x51c   :  { %v2990_v50 = vsub.f32 %v2910_v46, %v2913_v48  ;;  %v2981_v53 = vsub.f32 %v2979_v49, %v2980_v51 }
 0x51d   :  { %v2073_v37 = vsub.f32 %v2071_v32, %v2072_v34 }
 0x51e   :  { %v2991_v52 = vand.u32 4294901760, %v2990_v50  ;;  %v2982_v55 = vand.u32 4294901760, %v2981_v53 }
 0x51f   :  { %9758 = vmatmul.mubr.f32.vlgmr.msra.gmra.mrb[4].mxu0 %v1618_v3  ;;  %v2074_v39 = vand.u32 4294901760, %v2073_v37 }
 0x520   :  { %9791 = vmatpush3.xpose.msra.mxu0 %v10990_v21  ;;  %9792 = vmatprep.mubr.msk.f32.mxu0 %vm10808_vm1, %v10807_v10  ;;  %v2992_v54 = vsub.f32 %v2990_v50, %v2991_v52 }
 0x521   :  { %9763 = vmatmul.mubr.f32.vlgmr.msra.gmra.mrb[4].mxu1 %v2074_v39  ;;  %9795 = vmatprep.subr.mxu0 %v10807_v10 }
 0x522   :  { %9766 = vmatpush3.msra.mxu1 %v2085_v40  ;;  %9767 = vmatprep.mubr.msk.f32.mxu1 %vm10808_vm1, %v10807_v10  ;;  %v2993_v56 = vand.u32 4294901760, %v2992_v54 }
 0x523   :  { %9793 = vmatmul.mubr.f32.vlgmr.msra.gmra.mrb[6].mxu0 %v2528_v41  ;;  %9770 = vmatprep.subr.mxu1 %v10807_v10 }
 0x524   :  { %9796 = vmatpush3.xpose.msra.mxu0 %v2539_v42  ;;  %9797 = vmatprep.mubr.msk.f32.mxu0 %vm10808_vm1, %v10807_v10 }
 0x525   :  { %9800 = vmatprep.subr.mxu0 %v10807_v10 }
 0x529   :  { %9768 = vmatmul.mubr.f32.vlgmr.msra.gmra.mrb[4].mxu1 %v10998_v29 }
 0x52a   :  { %9771 = vmatpush3.msra.mxu1 %v2082_v25  ;;  %9772 = vmatprep.mubr.msk.f32.mxu1 %vm10808_vm1, %v10807_v10 }
 0x52b   :  { %9798 = vmatmul.mubr.f32.vlgmr.msra.gmra.mrb[6].mxu0 %v10992_v22  ;;  %9775 = vmatprep.subr.mxu1 %v10807_v10 }
 0x52c   :  { %9801 = vmatpush3.xpose.msra.mxu0 %v2536_v27  ;;  %9802 = vmatprep.mubr.msk.f32.mxu0 %vm10808_vm1, %v10807_v10 }
 0x52d   :  { %9805 = vmatprep.subr.mxu0 %v10807_v10 }
 0x531   :  { %9773 = vmatmul.mubr.f32.vlgmr.msra.gmra.mrb[4].mxu1 %v2071_v32 }
 0x532   :  { %9776 = vmatpush3.msra.mxu1 %v10981_v17  ;;  %9777 = vmatprep.mubr.msk.f32.mxu1 %vm10808_vm1, %v10807_v10 }
 0x533   :  { %9803 = vmatmul.mubr.f32.vlgmr.msra.gmra.mrb[6].mxu0 %v2525_v26  ;;  %9780 = vmatprep.subr.mxu1 %v10807_v10 }
 0x534   :  { %9806 = vmatpush3.xpose.msra.mxu0 %v10990_v21  ;;  %9807 = vmatprep.mubr.msk.f32.mxu0 %vm10808_vm1, %v10807_v10 }
 0x535   :  { %9810 = vmatprep.subr.mxu0 %v10807_v10 }
 0x539   :  { %9778 = vmatmul.mubr.f32.vlgmr.msra.gmra.mrb[4].mxu1 %v2072_v34 }
 0x53a   :  { %9781 = vmatpush3.msra.mxu1 %v2083_v30  ;;  %9782 = vmatprep.mubr.msk.f32.mxu1 %vm10808_vm1, %v10807_v10 }
 0x53b   :  { %9808 = vmatmul.mubr.f32.vlgmr.msra.gmra.mrb[6].mxu0 %v2526_v31  ;;  %9785 = vmatprep.subr.mxu1 %v10807_v10 }
 0x53c   :  { %9811 = vmatpush3.xpose.msra.mxu0 %v2537_v33  ;;  %9812 = vmatprep.mubr.msk.f32.mxu0 %vm10808_vm1, %v10807_v10 }
 0x53d   :  { %9815 = vmatprep.subr.mxu0 %v10807_v10 }
 0x541   :  { %9783 = vmatmul.mubr.f32.vlgmr.msra.gmra.mrb[4].mxu1 %v10998_v29 }
 0x542   :  { %9786 = vmatpush3.msra.mxu1 %v10981_v17  ;;  %9787 = vmatprep.mubr.msk.f32.mxu1 %vm10808_vm1, %v10807_v10 }
 0x543   :  { %9813 = vmatmul.mubr.f32.vlgmr.msra.gmra.mrb[6].mxu0 %v10992_v22  ;;  %9820 = vmatprep.subr.mxu1 %v10807_v10 }
 0x544   :  { %9816 = vmatpush3.xpose.msra.mxu0 %v10990_v21  ;;  %9817 = vmatprep.mubr.msk.f32.mxu0 %vm10808_vm1, %v10807_v10 }
 0x545   :  { %9850 = vmatprep.subr.mxu0 %v10807_v10 }
 0x549   :  { %9788 = vmatmul.mubr.f32.vlgmr.msra.gmra.mrb[4].mxu1 %v10998_v29 }
 0x54a   :  { %9821 = vmatpush3.xpose.msra.mxu1 %v2913_v48  ;;  %9822 = vmatprep.mubr.msk.f32.mxu1 %vm10808_vm1, %v10807_v10 }
 0x54b   :  { %9818 = vmatmul.mubr.f32.vlgmr.msra.gmra.mrb[6].mxu0 %v10992_v22  ;;  %9825 = vmatprep.subr.mxu1 %v10807_v10 }
 0x54c   :  { %9852 = vmatprep.mubr.msk.f32.mxu0 %vm10808_vm1, %v10807_v10 }
 0x54d   :  { %9823 = vmatmul.mubr.f32.vlgmr.msra.gmra.mrb[6].mxu1 %v2982_v55 }
 0x54e   :  { %9826 = vmatpush3.xpose.msra.mxu1 %v2993_v56  ;;  %9827 = vmatprep.mubr.msk.f32.mxu1 %vm10808_vm1, %v10807_v10 }
 0x54f   :  { %9830 = vmatprep.subr.mxu1 %v10807_v10 }
 0x555   :  { %9828 = vmatmul.mubr.f32.vlgmr.msra.gmra.mrb[6].mxu1 %v2978_v47 }
 0x556   :  { %9831 = vmatpush3.xpose.msra.mxu1 %v2990_v50  ;;  %9832 = vmatprep.mubr.msk.f32.mxu1 %vm10808_vm1, %v10807_v10 }
 0x557   :  { %9835 = vmatprep.subr.mxu1 %v10807_v10 }
 0x55d   :  { %9833 = vmatmul.mubr.f32.vlgmr.msra.gmra.mrb[6].mxu1 %v2979_v49 }
 0x55e   :  { %9836 = vmatpush3.xpose.msra.mxu1 %v2913_v48  ;;  %9837 = vmatprep.mubr.msk.f32.mxu1 %vm10808_vm1, %v10807_v10 }
 0x55f   :  { %9840 = vmatprep.subr.mxu1 %v10807_v10 }
 0x565   :  { %9838 = vmatmul.mubr.f32.vlgmr.msra.gmra.mrb[6].mxu1 %v2980_v51 }
 0x566   :  { %9841 = vmatpush3.xpose.msra.mxu1 %v2991_v52  ;;  %9842 = vmatprep.mubr.msk.f32.mxu1 %vm10808_vm1, %v10807_v10 }
 0x567   :  { %9845 = vmatprep.subr.mxu1 %v10807_v10 }
 0x56d   :  { %9843 = vmatmul.mubr.f32.vlgmr.msra.gmra.mrb[6].mxu1 %v2978_v47 }
 0x56e   :  { %9846 = vmatpush3.xpose.msra.mxu1 %v2913_v48  ;;  %9847 = vmatprep.mubr.msk.f32.mxu1 %vm10808_vm1, %v10807_v10 }
 0x56f   :  { %9880 = vmatprep.subr.mxu1 %v10807_v10 }
 0x575   :  { %9848 = vmatmul.mubr.f32.vlgmr.msra.gmra.mrb[6].mxu1 %v2978_v47 }
 0x576   :  { %9882 = vmatprep.mubr.msk.f32.mxu1 %vm10808_vm1, %v10807_v10 }
 0x5f2   :  { %v11072_v57 = vpop.f32.mrb[4].mxu0 }
 0x5f3   :  { %v9759_v58 = vpop.f32.mrb[5].mxu0 }
 0x61c   :  { %v11074_v59 = vpop.f32.mrb[4].mxu1 }
 0x61d   :  { %v9789_v60 = vpop.f32.mrb[5].mxu1 }
 0x61e   :  { %v2900_v61 = vpop.f32.mrb[6].mxu0 }
 0x61f   :  { %v3358_v62 = vmul.f32 0.35355338, %v2900_v61  ;;  %v9819_v63 = vpop.f32.mrb[7].mxu0 }
 0x621   :  { %v3360_v0 = vsel %vm1523_vm3, %v3358_v62, -inf }
 0x622   :  { %3361 = vmax.xlane.f32.xlu0 %v3360_v0 }
 0x648   :  { %v3354_v1 = vpop.f32.mrb[6].mxu1 }
 0x649   :  { %v3359_v2 = vmul.f32 0.35355338, %v3354_v1  ;;  %v9849_v3 = vpop.f32.mrb[7].mxu1 }
 0x64b   :  { %v3363_v4 = vsel %vm1523_vm3, %v3359_v2, -inf }
 0x64c   :  { %3364 = vmax.xlane.f32.xlu1 %v3363_v4 }
 0x65d   :  { %3834 = vrot.lane.b32.xlu1 %v10912_v11, %s10813_s16 }
 0x661   :  { %4286 = vrot.lane.b32.xlu1 %v10915_v12, %s10814_s17 }
 0x665   :  { %4740 = vrot.lane.b32.xlu1 %v10912_v11, %s10814_s17 }
 0x669   :  { %4742 = vrot.lane.b32.xlu1 %v10912_v11, %s10815_s18 }
 0x6af   :  { %v3362_v5 = vpop.xlane.xlu0 %3361 }
 0x6b0   :  { %v3366_v6 = vsub.f32 %v3358_v62, %v3362_v5 }
 0x6b2   :  { %v3368_v7 = vmul.f32 1.442695, %v3366_v6 }
 0x6b4   :  { %10745 = vpow2.f32 %v3368_v7 }
 0x6be   :  { %v10746_v8 = vpop.eup %10745 }
 0x6bf   :  { %v3372_v9 = vsel %vm1523_vm3, %v10746_v8, 0.0 }
 0x6c0   :  { %3373 = vadd.xlane.f32.xlu0 %v3372_v9 }
 0x6d9   :  { %v3365_v13 = vpop.xlane.xlu1 %3364 }
 0x6da   :  { %v3367_v14 = vsub.f32 %v3359_v2, %v3365_v13 }
 0x6dc   :  { %v3370_v15 = vmul.f32 1.442695, %v3367_v14 }
 0x6dd   :  { %v3835_v16 = vpop.permute.xlu1 %3834 }
 0x6de   :  { %10747 = vpow2.f32 %v3370_v15  ;;  %v11083_v17 = vand.u32 4294901760, %v3835_v16 }
 0x6e0   :  { %9881 = vmatpush3.msra.mxu1 %v11083_v17  ;;  %v3918_v36 = vsub.f32 %v3835_v16, %v11083_v17 }
 0x6e1   :  { %9885 = vmatprep.subr.mxu1 %v10807_v10  ;;  %v4287_v48 = vpop.permute.xlu1 %4286 }
 0x6e2   :  { %v3919_v41 = vand.u32 4294901760, %v3918_v36  ;;  %v4290_v50 = vsel %vm617_vm2, %v4287_v48, 0 }
 0x6e3   :  { %v11116_v52 = vand.u32 4294901760, %v4290_v50 }
 0x6e4   :  { %v3920_v44 = vsub.f32 %v3918_v36, %v3919_v41 }
 0x6e5   :  { %v4361_v54 = vsub.f32 %v4290_v50, %v11116_v52  ;;  %v4741_v56 = vpop.permute.xlu1 %4740 }
 0x6e6   :  { %v3921_v47 = vand.u32 4294901760, %v3920_v44  ;;  %v4744_v0 = vsel %vm617_vm2, %v4741_v56, 0 }
 0x6e7   :  { %v4362_v58 = vand.u32 4294901760, %v4361_v54  ;;  %v11142_v3 = vand.u32 4294901760, %v4744_v0 }
 0x6e8   :  { %v10748_v18 = vpop.eup %10747 }
 0x6e9   :  { %v3375_v19 = vsel %vm1523_vm3, %v10748_v18, 0.0  ;;  %v4363_v61 = vsub.f32 %v4361_v54, %v4362_v58  ;;  %v4743_v62 = vpop.permute.xlu1 %4742  ;;  %v4815_v6 = vsub.f32 %v4744_v0, %v11142_v3 }
 0x6ea   :  { %3376 = vadd.xlane.f32.xlu0 %v3375_v19  ;;  %v4746_v1 = vsel %vm617_vm2, %v4743_v62, 0 }
 0x6eb   :  { %v4364_v2 = vand.u32 4294901760, %v4363_v61  ;;  %v4749_v5 = vand.u32 4294901760, %v4746_v1 }
 0x6ed   :  { %v4826_v7 = vsub.f32 %v4746_v1, %v4749_v5 }
 0x6ef   :  { %v4827_v9 = vand.u32 4294901760, %v4826_v7 }
 0x6f1   :  { %v4828_v14 = vsub.f32 %v4826_v7, %v4827_v9 }
 0x6f3   :  { %v4829_v16 = vand.u32 4294901760, %v4828_v14 }
 0x700   :  { %3382 = vrot.lane.b32.xlu0 %v10915_v12, %s10813_s16  ;;  %s9259_s16 = sshll.u32 %s10823_s15, 4  ;;  %s9260_s16 = int_to_ptr.vmem [resolvable:$true] %s9259_s16 }
 0x701   :  { %s10783_s17 = scalar_lea.vmem %s9260_s16, 256  ;;  %p10788_p1 = scmp.lt.s32.totalorder %s9260_s16, %s9260_s16 }
 0x702   :  { %p10784_p0 = scmp.ne.s32.totalorder %s9260_s16, %s10783_s17  ;;  %p10789_p2 = scmp.lt.s32.totalorder %s10783_s17, %s10783_s17 }
 0x704   :  { %4288 = vrot.lane.b32.xlu0 %v10915_v12, %s10815_s18  ;;  %p10790_p3 = por %p10789_p2, %p10788_p1 }
 0x706   :  { %p10791_p4 = pnand %p10790_p3, %p10784_p0 }
 0x74d   :  { %v3374_v20 = vpop.xlane.xlu0 %3373 }
 0x74e   :  { %10749 = vrcp.f32 %v3374_v20 }
 0x758   :  { %v10750_v21 = vpop.eup %10749 }
 0x759   :  { %v3379_v22 = vmul.f32 %v10750_v21, %v10746_v8  ;;  %v4816_v8 = vand.u32 4294901760, %v4815_v6 }
 0x75b   :  { %v3386_v23 = vsel %vm1523_vm3, %v3379_v22, 0  ;;  %v4817_v13 = vsub.f32 %v4815_v6, %v4816_v8 }
 0x75c   :  { %v11091_v24 = vand.u32 4294901760, %v3386_v23 }
 0x75d   :  { %v4818_v15 = vand.u32 4294901760, %v4817_v13 }
 0x75e   :  { %v3455_v25 = vsub.f32 %v3386_v23, %v11091_v24 }
 0x760   :  { %v3456_v26 = vand.u32 4294901760, %v3455_v25 }
 0x762   :  { %v3457_v28 = vsub.f32 %v3455_v25, %v3456_v26 }
 0x764   :  { %v3458_v31 = vand.u32 4294901760, %v3457_v28 }
 0x777   :  { %v3377_v27 = vpop.xlane.xlu0 %3376 }
 0x778   :  { %10751 = vrcp.f32 %v3377_v27 }
 0x77b   :  { %v3383_v29 = vpop.permute.xlu0 %3382 }
 0x77c   :  { %v3389_v30 = vand.u32 4294901760, %v3383_v29 }
 0x77e   :  { %v3466_v32 = vsub.f32 %v3383_v29, %v3389_v30  ;;  %9851 = vmatpush3.msra.mxu0 %v3389_v30 }
 0x77f   :  { %9853 = vmatmul.mubr.f32.vlgmr.msra.gmra.mrb[8].mxu0 %v3458_v31  ;;  %9855 = vmatprep.subr.mxu0 %v10807_v10  ;;  %v4289_v49 = vpop.permute.xlu0 %4288 }
 0x780   :  { %v3467_v33 = vand.u32 4294901760, %v3466_v32  ;;  %9857 = vmatprep.mubr.msk.f32.mxu0 %vm10808_vm1, %v10807_v10  ;;  %v4292_v51 = vsel %vm617_vm2, %v4289_v49, 0 }
 0x781   :  { %v11120_v53 = vand.u32 4294901760, %v4292_v51 }
 0x782   :  { %v10752_v34 = vpop.eup %10751  ;;  %v3468_v35 = vsub.f32 %v3466_v32, %v3467_v33 }
 0x783   :  { %v3381_v37 = vmul.f32 %v10752_v34, %v10748_v18  ;;  %v4372_v55 = vsub.f32 %v4292_v51, %v11120_v53 }
 0x784   :  { %v3469_v38 = vand.u32 4294901760, %v3468_v35 }
 0x785   :  { %v3838_v39 = vsel %vm1523_vm3, %v3381_v37, 0  ;;  %v4373_v60 = vand.u32 4294901760, %v4372_v55 }
 0x786   :  { %9856 = vmatpush3.msra.mxu0 %v3469_v38  ;;  %v11099_v40 = vand.u32 4294901760, %v3838_v39 }
 0x787   :  { %9858 = vmatmul.mubr.f32.vlgmr.msra.gmra.mrb[8].mxu0 %v11091_v24  ;;  %9860 = vmatprep.subr.mxu0 %v10807_v10  ;;  %v4374_v63 = vsub.f32 %v4372_v55, %v4373_v60 }
 0x788   :  { %9861 = vmatpush3.msra.mxu0 %v3466_v32  ;;  %9862 = vmatprep.mubr.msk.f32.mxu0 %vm10808_vm1, %v10807_v10  ;;  %v3907_v42 = vsub.f32 %v3838_v39, %v11099_v40 }
 0x789   :  { %9865 = vmatprep.subr.mxu0 %v10807_v10  ;;  %v4375_v4 = vand.u32 4294901760, %v4374_v63 }
 0x78a   :  { %v3908_v43 = vand.u32 4294901760, %v3907_v42 }
 0x78c   :  { %v3909_v45 = vsub.f32 %v3907_v42, %v3908_v43 }
 0x78e   :  { %v3910_v46 = vand.u32 4294901760, %v3909_v45 }
 0x78f   :  { %9863 = vmatmul.mubr.f32.vlgmr.msra.gmra.mrb[8].mxu0 %v3455_v25 }
 0x790   :  { %9866 = vmatpush3.msra.mxu0 %v3389_v30  ;;  %9883 = vmatmul.mubr.f32.vlgmr.msra.gmra.mrb[8].mxu1 %v3910_v46 }
 0x791   :  { %9886 = vmatpush3.msra.mxu1 %v3921_v47  ;;  %9867 = vmatprep.mubr.msk.f32.mxu0 %vm10808_vm1, %v10807_v10 }
 0x792   :  { %9870 = vmatprep.subr.mxu0 %v10807_v10  ;;  %9887 = vmatprep.mubr.msk.f32.mxu1 %vm10808_vm1, %v10807_v10 }
 0x793   :  { %9890 = vmatprep.subr.mxu1 %v10807_v10 }
 0x797   :  { %9868 = vmatmul.mubr.f32.vlgmr.msra.gmra.mrb[8].mxu0 %v3456_v26 }
 0x798   :  { %9871 = vmatpush3.msra.mxu0 %v3467_v33  ;;  %9888 = vmatmul.mubr.f32.vlgmr.msra.gmra.mrb[8].mxu1 %v11099_v40 }
 0x799   :  { %9891 = vmatpush3.msra.mxu1 %v3918_v36  ;;  %9872 = vmatprep.mubr.msk.f32.mxu0 %vm10808_vm1, %v10807_v10 }
 0x79a   :  { %9875 = vmatprep.subr.mxu0 %v10807_v10  ;;  %9892 = vmatprep.mubr.msk.f32.mxu1 %vm10808_vm1, %v10807_v10 }
 0x79b   :  { %9895 = vmatprep.subr.mxu1 %v10807_v10 }
 0x79f   :  { %9873 = vmatmul.mubr.f32.vlgmr.msra.gmra.mrb[8].mxu0 %v11091_v24 }
 0x7a0   :  { %9876 = vmatpush3.msra.mxu0 %v3389_v30  ;;  %9893 = vmatmul.mubr.f32.vlgmr.msra.gmra.mrb[8].mxu1 %v3907_v42 }
 0x7a1   :  { %9896 = vmatpush3.msra.mxu1 %v11083_v17  ;;  %9877 = vmatprep.mubr.msk.f32.mxu0 %vm10808_vm1, %v10807_v10 }
 0x7a2   :  { %9910 = vmatprep.subr.mxu0 %v10807_v10  ;;  %9897 = vmatprep.mubr.msk.f32.mxu1 %vm10808_vm1, %v10807_v10 }
 0x7a3   :  { %9900 = vmatprep.subr.mxu1 %v10807_v10 }
 0x7a7   :  { %9878 = vmatmul.mubr.f32.vlgmr.msra.gmra.mrb[8].mxu0 %v11091_v24 }
 0x7a8   :  { %9911 = vmatpush3.xpose.msra.mxu0 %v11120_v53  ;;  %9898 = vmatmul.mubr.f32.vlgmr.msra.gmra.mrb[8].mxu1 %v3908_v43 }
 0x7a9   :  { %9901 = vmatpush3.msra.mxu1 %v3919_v41  ;;  %9912 = vmatprep.mubr.msk.f32.mxu0 %vm10808_vm1, %v10807_v10 }
 0x7aa   :  { %9915 = vmatprep.subr.mxu0 %v10807_v10  ;;  %9902 = vmatprep.mubr.msk.f32.mxu1 %vm10808_vm1, %v10807_v10 }
 0x7ab   :  { %9913 = vmatmul.mubr.f32.vlgmr.msra.gmra.mrb[10].mxu0 %v4364_v2  ;;  %9905 = vmatprep.subr.mxu1 %v10807_v10 }
 0x7ac   :  { %9916 = vmatpush3.xpose.msra.mxu0 %v4375_v4  ;;  %9917 = vmatprep.mubr.msk.f32.mxu0 %vm10808_vm1, %v10807_v10 }
 0x7ad   :  { %9920 = vmatprep.subr.mxu0 %v10807_v10 }
 0x7b0   :  { %9903 = vmatmul.mubr.f32.vlgmr.msra.gmra.mrb[8].mxu1 %v11099_v40 }
 0x7b1   :  { %9906 = vmatpush3.msra.mxu1 %v11083_v17  ;;  %9907 = vmatprep.mubr.msk.f32.mxu1 %vm10808_vm1, %v10807_v10 }
 0x7b2   :  { %9940 = vmatprep.subr.mxu1 %v10807_v10 }
 0x7b3   :  { %9918 = vmatmul.mubr.f32.vlgmr.msra.gmra.mrb[10].mxu0 %v11116_v52 }
 0x7b4   :  { %9921 = vmatpush3.xpose.msra.mxu0 %v4372_v55  ;;  %9922 = vmatprep.mubr.msk.f32.mxu0 %vm10808_vm1, %v10807_v10 }
 0x7b5   :  { %9925 = vmatprep.subr.mxu0 %v10807_v10 }
 0x7b8   :  { %9908 = vmatmul.mubr.f32.vlgmr.msra.gmra.mrb[8].mxu1 %v11099_v40 }
 0x7b9   :  { %9941 = vmatpush3.xpose.msra.mxu1 %v4749_v5  ;;  %9942 = vmatprep.mubr.msk.f32.mxu1 %vm10808_vm1, %v10807_v10 }
 0x7ba   :  { %9945 = vmatprep.subr.mxu1 %v10807_v10 }
 0x7bb   :  { %9923 = vmatmul.mubr.f32.vlgmr.msra.gmra.mrb[10].mxu0 %v4361_v54 }
 0x7bc   :  { %9926 = vmatpush3.xpose.msra.mxu0 %v11120_v53  ;;  %9943 = vmatmul.mubr.f32.vlgmr.msra.gmra.mrb[10].mxu1 %v4818_v15 }
 0x7bd   :  { %9946 = vmatpush3.xpose.msra.mxu1 %v4829_v16  ;;  %9927 = vmatprep.mubr.msk.f32.mxu0 %vm10808_vm1, %v10807_v10 }
 0x7be   :  { %9930 = vmatprep.subr.mxu0 %v10807_v10  ;;  %9947 = vmatprep.mubr.msk.f32.mxu1 %vm10808_vm1, %v10807_v10 }
 0x7bf   :  { %9950 = vmatprep.subr.mxu1 %v10807_v10 }
 0x7c3   :  { %9928 = vmatmul.mubr.f32.vlgmr.msra.gmra.mrb[10].mxu0 %v4362_v58 }
 0x7c4   :  { %9931 = vmatpush3.xpose.msra.mxu0 %v4373_v60  ;;  %9948 = vmatmul.mubr.f32.vlgmr.msra.gmra.mrb[10].mxu1 %v11142_v3 }
 0x7c5   :  { %9951 = vmatpush3.xpose.msra.mxu1 %v4826_v7  ;;  %9932 = vmatprep.mubr.msk.f32.mxu0 %vm10808_vm1, %v10807_v10 }
 0x7c6   :  { %9935 = vmatprep.subr.mxu0 %v10807_v10  ;;  %9952 = vmatprep.mubr.msk.f32.mxu1 %vm10808_vm1, %v10807_v10 }
 0x7c7   :  { %9955 = vmatprep.subr.mxu1 %v10807_v10 }
 0x7cb   :  { %9933 = vmatmul.mubr.f32.vlgmr.msra.gmra.mrb[10].mxu0 %v11116_v52 }
 0x7cc   :  { %9936 = vmatpush3.xpose.msra.mxu0 %v11120_v53  ;;  %9953 = vmatmul.mubr.f32.vlgmr.msra.gmra.mrb[10].mxu1 %v4815_v6 }
 0x7cd   :  { %9956 = vmatpush3.xpose.msra.mxu1 %v4749_v5  ;;  %9937 = vmatprep.mubr.msk.f32.mxu0 %vm10808_vm1, %v10807_v10 }
 0x7ce   :  { %9957 = vmatprep.mubr.msk.f32.mxu1 %vm10808_vm1, %v10807_v10  ;;  %9960 = vmatprep.subr.mxu1 %v10807_v10 }
 0x7cf   :  { %9970 = vmatprep.subr.mxu0 %v10807_v10 }
 0x7d3   :  { %9938 = vmatmul.mubr.f32.vlgmr.msra.gmra.mrb[10].mxu0 %v11116_v52 }
 0x7d4   :  { %9958 = vmatmul.mubr.f32.vlgmr.msra.gmra.mrb[10].mxu1 %v4816_v8  ;;  %9972 = vmatprep.mubr.msk.f32.mxu0 %vm10808_vm1, %v10807_v10 }
 0x7d5   :  { %9961 = vmatpush3.xpose.msra.mxu1 %v4827_v9  ;;  %9962 = vmatprep.mubr.msk.f32.mxu1 %vm10808_vm1, %v10807_v10 }
 0x7d6   :  { %9965 = vmatprep.subr.mxu1 %v10807_v10 }
 0x7dc   :  { %9963 = vmatmul.mubr.f32.vlgmr.msra.gmra.mrb[10].mxu1 %v11142_v3 }
 0x7dd   :  { %9966 = vmatpush3.xpose.msra.mxu1 %v4749_v5  ;;  %9967 = vmatprep.mubr.msk.f32.mxu1 %vm10808_vm1, %v10807_v10 }
 0x7de   :  { %10000 = vmatprep.subr.mxu1 %v10807_v10 }
 0x7e4   :  { %9968 = vmatmul.mubr.f32.vlgmr.msra.gmra.mrb[10].mxu1 %v11142_v3 }
 0x7e5   :  { %10002 = vmatprep.mubr.msk.f32.mxu1 %vm10808_vm1, %v10807_v10 }
 0x87a   :  { %v11200_v17 = vpop.f32.mrb[8].mxu0 }
 0x87b   :  { %v9879_v18 = vpop.f32.mrb[9].mxu0 }
 0x88b   :  { %v11202_v19 = vpop.f32.mrb[8].mxu1 }
 0x88c   :  { %v9909_v20 = vpop.f32.mrb[9].mxu1 }
 0x8a6   :  { %v4736_v21 = vpop.f32.mrb[10].mxu0 }
 0x8a7   :  { %v5194_v22 = vmul.f32 0.35355338, %v4736_v21  ;;  %v9939_v23 = vpop.f32.mrb[11].mxu0 }
 0x8a9   :  { %v5196_v24 = vsel %vm1523_vm3, %v5194_v22, -inf }
 0x8aa   :  { %5197 = vmax.xlane.f32.xlu0 %v5196_v24 }
 0x8b7   :  { %v5190_v25 = vpop.f32.mrb[10].mxu1 }
 0x8b8   :  { %v5195_v26 = vmul.f32 0.35355338, %v5190_v25  ;;  %v9969_v27 = vpop.f32.mrb[11].mxu1 }
 0x8ba   :  { %v5199_v28 = vsel %vm1523_vm3, %v5195_v26, -inf }
 0x8bb   :  { %5200 = vmax.xlane.f32.xlu1 %v5199_v28 }
 0x8cc   :  { %5670 = vrot.lane.b32.xlu1 %v10912_v11, %s10816_s19 }
 0x8d0   :  { %6122 = vrot.lane.b32.xlu1 %v10915_v12, %s10817_s20 }
 0x8d4   :  { %6576 = vrot.lane.b32.xlu1 %v10912_v11, %s10817_s20 }
 0x8d8   :  { %6578 = vrot.lane.b32.xlu1 %v10912_v11, %s10818_s21 }
 0x937   :  { %v5198_v29 = vpop.xlane.xlu0 %5197 }
 0x938   :  { %v5202_v30 = vsub.f32 %v5194_v22, %v5198_v29 }
 0x93a   :  { %v5204_v31 = vmul.f32 1.442695, %v5202_v30 }
 0x93c   :  { %10753 = vpow2.f32 %v5204_v31 }
 0x946   :  { %v10754_v32 = vpop.eup %10753 }
 0x947   :  { %v5208_v33 = vsel %vm1523_vm3, %v10754_v32, 0.0 }
 0x948   :  { %v5201_v34 = vpop.xlane.xlu1 %5200  ;;  %5209 = vadd.xlane.f32.xlu0 %v5208_v33 }
 0x949   :  { %v5203_v35 = vsub.f32 %v5195_v26, %v5201_v34 }
 0x94b   :  { %v5206_v36 = vmul.f32 1.442695, %v5203_v35 }
 0x94c   :  { %v5671_v37 = vpop.permute.xlu1 %5670 }
 0x94d   :  { %10755 = vpow2.f32 %v5206_v36  ;;  %v11211_v38 = vand.u32 4294901760, %v5671_v37 }
 0x94f   :  { %10001 = vmatpush3.msra.mxu1 %v11211_v38  ;;  %v5754_v58 = vsub.f32 %v5671_v37, %v11211_v38 }
 0x950   :  { %10005 = vmatprep.subr.mxu1 %v10807_v10  ;;  %v6123_v7 = vpop.permute.xlu1 %6122 }
 0x951   :  { %v5755_v0 = vand.u32 4294901760, %v5754_v58  ;;  %v6126_v9 = vsel %vm617_vm2, %v6123_v7, 0 }
 0x952   :  { %v11244_v14 = vand.u32 4294901760, %v6126_v9 }
 0x953   :  { %v5756_v3 = vsub.f32 %v5754_v58, %v5755_v0 }
 0x954   :  { %v6197_v16 = vsub.f32 %v6126_v9, %v11244_v14  ;;  %v6577_v20 = vpop.permute.xlu1 %6576 }
 0x955   :  { %v5757_v6 = vand.u32 4294901760, %v5756_v3  ;;  %v6580_v26 = vsel %vm617_vm2, %v6577_v20, 0 }
 0x956   :  { %v6198_v21 = vand.u32 4294901760, %v6197_v16  ;;  %v11270_v29 = vand.u32 4294901760, %v6580_v26 }
 0x957   :  { %v10756_v39 = vpop.eup %10755 }
 0x958   :  { %v5211_v40 = vsel %vm1523_vm3, %v10756_v39, 0.0  ;;  %v6199_v23 = vsub.f32 %v6197_v16, %v6198_v21  ;;  %v6579_v24 = vpop.permute.xlu1 %6578 }
 0x959   :  { %5212 = vadd.xlane.f32.xlu0 %v5211_v40  ;;  %v6582_v27 = vsel %vm617_vm2, %v6579_v24, 0 }
 0x95a   :  { %v6200_v28 = vand.u32 4294901760, %v6199_v23  ;;  %v6585_v31 = vand.u32 4294901760, %v6582_v27 }
 0x95c   :  { %v6662_v33 = vsub.f32 %v6582_v27, %v6585_v31 }
 0x95e   :  { %v6663_v35 = vand.u32 4294901760, %v6662_v33 }
 0x960   :  { %v6664_v37 = vsub.f32 %v6662_v33, %v6663_v35 }
 0x96f   :  { %5218 = vrot.lane.b32.xlu0 %v10915_v12, %s10816_s19 }
 0x973   :  { %6124 = vrot.lane.b32.xlu0 %v10915_v12, %s10818_s21 }
 0x9d5   :  { %v5210_v41 = vpop.xlane.xlu0 %5209 }
 0x9d6   :  { %10757 = vrcp.f32 %v5210_v41 }
 0x9e0   :  { %v10758_v42 = vpop.eup %10757 }
 0x9e1   :  { %v5215_v43 = vmul.f32 %v10758_v42, %v10754_v32  ;;  %v6651_v32 = vsub.f32 %v6580_v26, %v11270_v29 }
 0x9e3   :  { %v5222_v44 = vsel %vm1523_vm3, %v5215_v43, 0  ;;  %v6652_v34 = vand.u32 4294901760, %v6651_v32 }
 0x9e4   :  { %v11219_v45 = vand.u32 4294901760, %v5222_v44 }
 0x9e5   :  { %v6653_v36 = vsub.f32 %v6651_v32, %v6652_v34 }
 0x9e6   :  { %v5213_v46 = vpop.xlane.xlu0 %5212  ;;  %v5291_v47 = vsub.f32 %v5222_v44, %v11219_v45 }
 0x9e7   :  { %10759 = vrcp.f32 %v5213_v46 }
 0x9e8   :  { %v5292_v48 = vand.u32 4294901760, %v5291_v47 }
 0x9ea   :  { %v5219_v49 = vpop.permute.xlu0 %5218  ;;  %v5293_v50 = vsub.f32 %v5291_v47, %v5292_v48 }
 0x9eb   :  { %v5225_v51 = vand.u32 4294901760, %v5219_v49 }
 0x9ec   :  { %v5294_v52 = vand.u32 4294901760, %v5293_v50 }
 0x9ed   :  { %v5302_v53 = vsub.f32 %v5219_v49, %v5225_v51  ;;  %9971 = vmatpush3.msra.mxu0 %v5225_v51 }
 0x9ee   :  { %9973 = vmatmul.mubr.f32.vlgmr.msra.gmra.mrb[12].mxu0 %v5294_v52  ;;  %9975 = vmatprep.subr.mxu0 %v10807_v10  ;;  %v6125_v8 = vpop.permute.xlu0 %6124 }
 0x9ef   :  { %v5303_v54 = vand.u32 4294901760, %v5302_v53  ;;  %9977 = vmatprep.mubr.msk.f32.mxu0 %vm10808_vm1, %v10807_v10  ;;  %v6128_v13 = vsel %vm617_vm2, %v6125_v8, 0 }
 0x9f0   :  { %v11248_v15 = vand.u32 4294901760, %v6128_v13 }
 0x9f1   :  { %v10760_v55 = vpop.eup %10759  ;;  %v5304_v56 = vsub.f32 %v5302_v53, %v5303_v54 }
 0x9f2   :  { %v5217_v60 = vmul.f32 %v10760_v55, %v10756_v39  ;;  %v6208_v18 = vsub.f32 %v6128_v13, %v11248_v15  ;;  %v6665_v39 = vand.u32 4294901760, %v6664_v37 }
 0x9f3   :  { %v5305_v61 = vand.u32 4294901760, %v5304_v56 }
 0x9f4   :  { %v5674_v62 = vsel %vm1523_vm3, %v5217_v60, 0  ;;  %v6209_v22 = vand.u32 4294901760, %v6208_v18 }
 0x9f5   :  { %9976 = vmatpush3.msra.mxu0 %v5305_v61  ;;  %v11227_v63 = vand.u32 4294901760, %v5674_v62 }
 0x9f6   :  { %9978 = vmatmul.mubr.f32.vlgmr.msra.gmra.mrb[12].mxu0 %v11219_v45  ;;  %9980 = vmatprep.subr.mxu0 %v10807_v10  ;;  %v6210_v25 = vsub.f32 %v6208_v18, %v6209_v22 }
 0x9f7   :  { %9981 = vmatpush3.msra.mxu0 %v5302_v53  ;;  %9982 = vmatprep.mubr.msk.f32.mxu0 %vm10808_vm1, %v10807_v10  ;;  %v5743_v1 = vsub.f32 %v5674_v62, %v11227_v63 }
 0x9f8   :  { %9985 = vmatprep.subr.mxu0 %v10807_v10  ;;  %v6211_v30 = vand.u32 4294901760, %v6210_v25 }
 0x9f9   :  { %v5744_v2 = vand.u32 4294901760, %v5743_v1 }
 0x9fb   :  { %v5745_v4 = vsub.f32 %v5743_v1, %v5744_v2 }
 0x9fd   :  { %v5746_v5 = vand.u32 4294901760, %v5745_v4 }
 0x9fe   :  { %9983 = vmatmul.mubr.f32.vlgmr.msra.gmra.mrb[12].mxu0 %v5291_v47 }
 0x9ff   :  { %9986 = vmatpush3.msra.mxu0 %v5225_v51  ;;  %10003 = vmatmul.mubr.f32.vlgmr.msra.gmra.mrb[12].mxu1 %v5746_v5 }
 0xa00   :  { %10006 = vmatpush3.msra.mxu1 %v5757_v6  ;;  %9987 = vmatprep.mubr.msk.f32.mxu0 %vm10808_vm1, %v10807_v10 }
 0xa01   :  { %9990 = vmatprep.subr.mxu0 %v10807_v10  ;;  %10007 = vmatprep.mubr.msk.f32.mxu1 %vm10808_vm1, %v10807_v10 }
 0xa02   :  { %10010 = vmatprep.subr.mxu1 %v10807_v10 }
 0xa06   :  { %9988 = vmatmul.mubr.f32.vlgmr.msra.gmra.mrb[12].mxu0 %v5292_v48 }
 0xa07   :  { %9991 = vmatpush3.msra.mxu0 %v5303_v54  ;;  %10008 = vmatmul.mubr.f32.vlgmr.msra.gmra.mrb[12].mxu1 %v11227_v63 }
 0xa08   :  { %10011 = vmatpush3.msra.mxu1 %v5754_v58  ;;  %9992 = vmatprep.mubr.msk.f32.mxu0 %vm10808_vm1, %v10807_v10 }
 0xa09   :  { %9995 = vmatprep.subr.mxu0 %v10807_v10  ;;  %10012 = vmatprep.mubr.msk.f32.mxu1 %vm10808_vm1, %v10807_v10 }
 0xa0a   :  { %10015 = vmatprep.subr.mxu1 %v10807_v10 }
 0xa0e   :  { %9993 = vmatmul.mubr.f32.vlgmr.msra.gmra.mrb[12].mxu0 %v11219_v45 }
 0xa0f   :  { %9996 = vmatpush3.msra.mxu0 %v5225_v51  ;;  %10013 = vmatmul.mubr.f32.vlgmr.msra.gmra.mrb[12].mxu1 %v5743_v1 }
 0xa10   :  { %10016 = vmatpush3.msra.mxu1 %v11211_v38  ;;  %9997 = vmatprep.mubr.msk.f32.mxu0 %vm10808_vm1, %v10807_v10 }
 0xa11   :  { %10030 = vmatprep.subr.mxu0 %v10807_v10  ;;  %10017 = vmatprep.mubr.msk.f32.mxu1 %vm10808_vm1, %v10807_v10 }
 0xa12   :  { %10020 = vmatprep.subr.mxu1 %v10807_v10 }
 0xa16   :  { %9998 = vmatmul.mubr.f32.vlgmr.msra.gmra.mrb[12].mxu0 %v11219_v45 }
 0xa17   :  { %10031 = vmatpush3.xpose.msra.mxu0 %v11248_v15  ;;  %10018 = vmatmul.mubr.f32.vlgmr.msra.gmra.mrb[12].mxu1 %v5744_v2 }
 0xa18   :  { %10021 = vmatpush3.msra.mxu1 %v5755_v0  ;;  %10032 = vmatprep.mubr.msk.f32.mxu0 %vm10808_vm1, %v10807_v10 }
 0xa19   :  { %10035 = vmatprep.subr.mxu0 %v10807_v10  ;;  %10022 = vmatprep.mubr.msk.f32.mxu1 %vm10808_vm1, %v10807_v10 }
 0xa1a   :  { %10033 = vmatmul.mubr.f32.vlgmr.msra.gmra.mrb[14].mxu0 %v6200_v28  ;;  %10025 = vmatprep.subr.mxu1 %v10807_v10 }
 0xa1b   :  { %10036 = vmatpush3.xpose.msra.mxu0 %v6211_v30  ;;  %10037 = vmatprep.mubr.msk.f32.mxu0 %vm10808_vm1, %v10807_v10 }
 0xa1c   :  { %10040 = vmatprep.subr.mxu0 %v10807_v10 }
 0xa1f   :  { %10023 = vmatmul.mubr.f32.vlgmr.msra.gmra.mrb[12].mxu1 %v11227_v63 }
 0xa20   :  { %10026 = vmatpush3.msra.mxu1 %v11211_v38  ;;  %10027 = vmatprep.mubr.msk.f32.mxu1 %vm10808_vm1, %v10807_v10  ;;  %v6654_v38 = vand.u32 4294901760, %v6653_v36 }
 0xa21   :  { %10060 = vmatprep.subr.mxu1 %v10807_v10 }
 0xa22   :  { %10038 = vmatmul.mubr.f32.vlgmr.msra.gmra.mrb[14].mxu0 %v11244_v14 }
 0xa23   :  { %10041 = vmatpush3.xpose.msra.mxu0 %v6208_v18  ;;  %10042 = vmatprep.mubr.msk.f32.mxu0 %vm10808_vm1, %v10807_v10 }
 0xa24   :  { %10045 = vmatprep.subr.mxu0 %v10807_v10 }
 0xa27   :  { %10028 = vmatmul.mubr.f32.vlgmr.msra.gmra.mrb[12].mxu1 %v11227_v63 }
 0xa28   :  { %10061 = vmatpush3.xpose.msra.mxu1 %v6585_v31  ;;  %10062 = vmatprep.mubr.msk.f32.mxu1 %vm10808_vm1, %v10807_v10 }
 0xa29   :  { %10065 = vmatprep.subr.mxu1 %v10807_v10 }
 0xa2a   :  { %10043 = vmatmul.mubr.f32.vlgmr.msra.gmra.mrb[14].mxu0 %v6197_v16 }
 0xa2b   :  { %10046 = vmatpush3.xpose.msra.mxu0 %v11248_v15  ;;  %10063 = vmatmul.mubr.f32.vlgmr.msra.gmra.mrb[14].mxu1 %v6654_v38 }
 0xa2c   :  { %10066 = vmatpush3.xpose.msra.mxu1 %v6665_v39  ;;  %10047 = vmatprep.mubr.msk.f32.mxu0 %vm10808_vm1, %v10807_v10 }
 0xa2d   :  { %10050 = vmatprep.subr.mxu0 %v10807_v10  ;;  %10067 = vmatprep.mubr.msk.f32.mxu1 %vm10808_vm1, %v10807_v10 }
 0xa2e   :  { %10070 = vmatprep.subr.mxu1 %v10807_v10 }
 0xa32   :  { %10048 = vmatmul.mubr.f32.vlgmr.msra.gmra.mrb[14].mxu0 %v6198_v21 }
 0xa33   :  { %10051 = vmatpush3.xpose.msra.mxu0 %v6209_v22  ;;  %10068 = vmatmul.mubr.f32.vlgmr.msra.gmra.mrb[14].mxu1 %v11270_v29 }
 0xa34   :  { %10071 = vmatpush3.xpose.msra.mxu1 %v6662_v33  ;;  %10052 = vmatprep.mubr.msk.f32.mxu0 %vm10808_vm1, %v10807_v10 }
 0xa35   :  { %10055 = vmatprep.subr.mxu0 %v10807_v10  ;;  %10072 = vmatprep.mubr.msk.f32.mxu1 %vm10808_vm1, %v10807_v10 }
 0xa36   :  { %10075 = vmatprep.subr.mxu1 %v10807_v10 }
 0xa3a   :  { %10053 = vmatmul.mubr.f32.vlgmr.msra.gmra.mrb[14].mxu0 %v11244_v14 }
 0xa3b   :  { %10056 = vmatpush3.xpose.msra.mxu0 %v11248_v15  ;;  %10073 = vmatmul.mubr.f32.vlgmr.msra.gmra.mrb[14].mxu1 %v6651_v32 }
 0xa3c   :  { %10076 = vmatpush3.xpose.msra.mxu1 %v6585_v31  ;;  %10057 = vmatprep.mubr.msk.f32.mxu0 %vm10808_vm1, %v10807_v10 }
 0xa3d   :  { %10077 = vmatprep.mubr.msk.f32.mxu1 %vm10808_vm1, %v10807_v10  ;;  %10080 = vmatprep.subr.mxu1 %v10807_v10 }
 0xa3e   :  { %10090 = vmatprep.subr.mxu0 %v10807_v10 }
 0xa42   :  { %10058 = vmatmul.mubr.f32.vlgmr.msra.gmra.mrb[14].mxu0 %v11244_v14 }
 0xa43   :  { %10078 = vmatmul.mubr.f32.vlgmr.msra.gmra.mrb[14].mxu1 %v6652_v34  ;;  %10092 = vmatprep.mubr.msk.f32.mxu0 %vm10808_vm1, %v10807_v10 }
 0xa44   :  { %10081 = vmatpush3.xpose.msra.mxu1 %v6663_v35  ;;  %10082 = vmatprep.mubr.msk.f32.mxu1 %vm10808_vm1, %v10807_v10 }
 0xa45   :  { %10085 = vmatprep.subr.mxu1 %v10807_v10 }
 0xa4b   :  { %10083 = vmatmul.mubr.f32.vlgmr.msra.gmra.mrb[14].mxu1 %v11270_v29 }
 0xa4c   :  { %10086 = vmatpush3.xpose.msra.mxu1 %v6585_v31  ;;  %10087 = vmatprep.mubr.msk.f32.mxu1 %vm10808_vm1, %v10807_v10 }
 0xa4d   :  { %10120 = vmatprep.subr.mxu1 %v10807_v10 }
 0xa53   :  { %10088 = vmatmul.mubr.f32.vlgmr.msra.gmra.mrb[14].mxu1 %v11270_v29 }
 0xa54   :  { %10122 = vmatprep.mubr.msk.f32.mxu1 %vm10808_vm1, %v10807_v10 }
 0xae9   :  { %v5666_v40 = vpop.f32.mrb[12].mxu0 }
 0xaea   :  { %v9999_v41 = vpop.f32.mrb[13].mxu0 }
 0xafa   :  { %v6118_v42 = vpop.f32.mrb[12].mxu1 }
 0xafb   :  { %v10029_v43 = vpop.f32.mrb[13].mxu1 }
 0xb15   :  { %v6572_v44 = vpop.f32.mrb[14].mxu0 }
 0xb16   :  { %v7030_v45 = vmul.f32 0.35355338, %v6572_v44  ;;  %v10059_v46 = vpop.f32.mrb[15].mxu0 }
 0xb18   :  { %v7032_v47 = vsel %vm1523_vm3, %v7030_v45, -inf }
 0xb19   :  { %7033 = vmax.xlane.f32.xlu0 %v7032_v47 }
 0xb26   :  { %v7026_v48 = vpop.f32.mrb[14].mxu1 }
 0xb27   :  { %v7031_v49 = vmul.f32 0.35355338, %v7026_v48  ;;  %v10089_v50 = vpop.f32.mrb[15].mxu1  ;;  %v10782_v48 = vld [vmem:[%s11577_s0 + $0x8] sm:$0xff] }
 0xb29   :  { %v7035_v51 = vsel %vm1523_vm3, %v7031_v49, -inf }
 0xb2a   :  { %7036 = vmax.xlane.f32.xlu1 %v7035_v51 }
 0xb3b   :  { %7506 = vrot.lane.b32.xlu1 %v10912_v11, %s10819_s22 }
 0xb3f   :  { %7960 = vrot.lane.b32.xlu1 %v11200_v17, %s10820_s23 }
 0xb43   :  { %7962 = vrot.lane.b32.xlu1 %v11202_v19, %s10820_s23 }
 0xb47   :  { %7970 = vrot.lane.b32.xlu1 %v6118_v42, %s10821_s24 }
 0xba6   :  { %v7034_v52 = vpop.xlane.xlu0 %7033 }
 0xba7   :  { %v7038_v53 = vsub.f32 %v7030_v45, %v7034_v52 }
 0xba9   :  { %v7040_v54 = vmul.f32 1.442695, %v7038_v53 }
 0xbab   :  { %10761 = vpow2.f32 %v7040_v54 }
 0xbb5   :  { %v10762_v55 = vpop.eup %10761 }
 0xbb6   :  { %v7044_v56 = vsel %vm1523_vm3, %v10762_v55, 0.0 }
 0xbb7   :  { %v7037_v58 = vpop.xlane.xlu1 %7036  ;;  %7045 = vadd.xlane.f32.xlu0 %v7044_v56 }
 0xbb8   :  { %v7039_v60 = vsub.f32 %v7031_v49, %v7037_v58 }
 0xbba   :  { %v7042_v11 = vmul.f32 1.442695, %v7039_v60 }
 0xbbb   :  { %v7507_v61 = vpop.permute.xlu1 %7506 }
 0xbbc   :  { %10763 = vpow2.f32 %v7042_v11  ;;  %v11336_v62 = vand.u32 4294901760, %v7507_v61 }
 0xbbe   :  { %10121 = vmatpush3.msra.mxu1 %v11336_v62  ;;  %v7590_v18 = vsub.f32 %v7507_v61, %v11336_v62  ;;  %v8030_v61 = vld [vmem:[%s11579_s2] sm:$0xff] }
 0xbbf   :  { %10125 = vmatprep.subr.mxu1 %v10807_v10  ;;  %v7961_v35 = vpop.permute.xlu1 %7960 }
 0xbc0   :  { %v7591_v24 = vand.u32 4294901760, %v7590_v18  ;;  %v7982_v37 = vsel %vm1523_vm3, %v11072_v57, %v7961_v35  ;;  %v9272_v35 = vld [vmem:[%s11581_s4 + $0x2] ss:$0 sm:$0xff] }
 0xbc2   :  { %v7592_v27 = vsub.f32 %v7590_v18, %v7591_v24 }
 0xbc3   :  { %v7963_v43 = vpop.permute.xlu1 %7962 }
 0xbc4   :  { %v7593_v30 = vand.u32 4294901760, %v7592_v27  ;;  %v7983_v45 = vsel %vm1523_vm3, %v11074_v59, %v7963_v43 }
 0xbc6   :  { %v10764_v17 = vpop.eup %10763 }
 0xbc7   :  { %v7047_v19 = vsel %vm1523_vm3, %v10764_v17, 0.0  ;;  %v7971_v44 = vpop.permute.xlu1 %7970 }
 0xbc8   :  { %7048 = vadd.xlane.f32.xlu0 %v7047_v19  ;;  %v7986_v57 = vsel %vm7984_vm5, %v7983_v45, %v7971_v44  ;;  %v8045_v19 = vand.u32 4294901760, %v8030_v61 }
 0xbde   :  { %7054 = vrot.lane.b32.xlu0 %v10915_v12, %s10819_s22 }
 0xbe2   :  { %7968 = vrot.lane.b32.xlu0 %v5666_v40, %s10821_s24 }
 0xc44   :  { %v7046_v63 = vpop.xlane.xlu0 %7045 }
 0xc45   :  { %10765 = vrcp.f32 %v7046_v63 }
 0xc4f   :  { %v10766_v0 = vpop.eup %10765 }
 0xc50   :  { %v7051_v1 = vmul.f32 %v10766_v0, %v10762_v55  ;;  %v8033_v0 = vld [vmem:[%s11579_s2 + $0x18] sm:$0xff] }
 0xc52   :  { %v7058_v2 = vsel %vm1523_vm3, %v7051_v1, 0 }
 0xc53   :  { %v7126_v3 = vand.u32 4294901760, %v7058_v2 }
 0xc55   :  { %v7049_v4 = vpop.xlane.xlu0 %7048  ;;  %v7127_v5 = vsub.f32 %v7058_v2, %v7126_v3  ;;  %v8054_v2 = vand.u32 4294901760, %v8033_v0 }
 0xc56   :  { %10767 = vrcp.f32 %v7049_v4 }
 0xc57   :  { %v7128_v6 = vand.u32 4294901760, %v7127_v5 }
 0xc59   :  { %v7055_v7 = vpop.permute.xlu0 %7054  ;;  %v7129_v8 = vsub.f32 %v7127_v5, %v7128_v6 }
 0xc5a   :  { %v7061_v9 = vand.u32 4294901760, %v7055_v7 }
 0xc5b   :  { %v7130_v13 = vand.u32 4294901760, %v7129_v8 }
 0xc5c   :  { %v7138_v14 = vsub.f32 %v7055_v7, %v7061_v9  ;;  %10091 = vmatpush3.msra.mxu0 %v7061_v9 }
 0xc5d   :  { %10093 = vmatmul.mubr.f32.vlgmr.msra.gmra.mrb[16].mxu0 %v7130_v13  ;;  %10095 = vmatprep.subr.mxu0 %v10807_v10  ;;  %v7969_v36 = vpop.permute.xlu0 %7968 }
 0xc5e   :  { %v7139_v12 = vand.u32 4294901760, %v7138_v14  ;;  %10097 = vmatprep.mubr.msk.f32.mxu0 %vm10808_vm1, %v10807_v10  ;;  %v7985_v38 = vsel %vm7984_vm5, %v7982_v37, %v7969_v36 }
 0xc60   :  { %v10768_v15 = vpop.eup %10767  ;;  %v7140_v16 = vsub.f32 %v7138_v14, %v7139_v12 }
 0xc61   :  { %v7053_v20 = vmul.f32 %v10768_v15, %v10764_v17  ;;  %v8032_v17 = vld [vmem:[%s11579_s2 + $0x10] sm:$0xff] }
 0xc62   :  { %v7141_v21 = vand.u32 4294901760, %v7140_v16  ;;  %v8051_v1 = vand.u32 4294901760, %v8032_v17 }
 0xc63   :  { %v7510_v22 = vsel %vm1523_vm3, %v7053_v20, 0 }
 0xc64   :  { %10096 = vmatpush3.msra.mxu0 %v7141_v21  ;;  %v7578_v23 = vand.u32 4294901760, %v7510_v22  ;;  %v11412_v4 = vpack.c.bf16 %v8054_v2, %v8051_v1 }
 0xc65   :  { %10098 = vmatmul.mubr.f32.vlgmr.msra.gmra.mrb[16].mxu0 %v7126_v3  ;;  %10100 = vmatprep.subr.mxu0 %v10807_v10 }
 0xc66   :  { %10101 = vmatpush3.msra.mxu0 %v7138_v14  ;;  %10102 = vmatprep.mubr.msk.f32.mxu0 %vm10808_vm1, %v10807_v10  ;;  %v7579_v25 = vsub.f32 %v7510_v22, %v7578_v23  ;;  %v8149_v14 = vsub.f32 %v8032_v17, %v8051_v1 }
 0xc67   :  { %10105 = vmatprep.subr.mxu0 %v10807_v10 }
 0xc68   :  { %v7580_v26 = vand.u32 4294901760, %v7579_v25 }
 0xc6a   :  { %v7581_v28 = vsub.f32 %v7579_v25, %v7580_v26 }
 0xc6c   :  { %v7582_v29 = vand.u32 4294901760, %v7581_v28 }
 0xc6d   :  { %10103 = vmatmul.mubr.f32.vlgmr.msra.gmra.mrb[16].mxu0 %v7127_v5  ;;  %v8135_v5 = vsub.f32 %v8030_v61, %v8045_v19 }
 0xc6e   :  { %10106 = vmatpush3.msra.mxu0 %v7061_v9  ;;  %10123 = vmatmul.mubr.f32.vlgmr.msra.gmra.mrb[16].mxu1 %v7582_v29 }
 0xc6f   :  { %10126 = vmatpush3.msra.mxu1 %v7593_v30  ;;  %10107 = vmatprep.mubr.msk.f32.mxu0 %vm10808_vm1, %v10807_v10  ;;  %v8136_v7 = vand.u32 4294901760, %v8135_v5 }
 0xc70   :  { %10110 = vmatprep.subr.mxu0 %v10807_v10  ;;  %10127 = vmatprep.mubr.msk.f32.mxu1 %vm10808_vm1, %v10807_v10 }
 0xc71   :  { %10130 = vmatprep.subr.mxu1 %v10807_v10 }
 0xc75   :  { %10108 = vmatmul.mubr.f32.vlgmr.msra.gmra.mrb[16].mxu0 %v7128_v6 }
 0xc76   :  { %10111 = vmatpush3.msra.mxu0 %v7139_v12  ;;  %10128 = vmatmul.mubr.f32.vlgmr.msra.gmra.mrb[16].mxu1 %v7578_v23  ;;  %v8156_v12 = vsub.f32 %v8033_v0, %v8054_v2 }
 0xc77   :  { %10131 = vmatpush3.msra.mxu1 %v7590_v18  ;;  %10112 = vmatprep.mubr.msk.f32.mxu0 %vm10808_vm1, %v10807_v10  ;;  %v8150_v18 = vand.u32 4294901760, %v8149_v14 }
 0xc78   :  { %10115 = vmatprep.subr.mxu0 %v10807_v10  ;;  %10132 = vmatprep.mubr.msk.f32.mxu1 %vm10808_vm1, %v10807_v10  ;;  %v8157_v20 = vand.u32 4294901760, %v8156_v12  ;;  %v10398_v28 = vpack.c.bf16 %v8156_v12, %v8149_v14 }
 0xc79   :  { %10135 = vmatprep.subr.mxu1 %v10807_v10  ;;  %v8151_v22 = vsub.f32 %v8149_v14, %v8150_v18  ;;  %v8615_v14 = vld [vmem:[%s11580_s3 + $0x8] sm:$0xff] }
 0xc7a   :  { %v10414_v30 = vpack.c.bf16 %v8157_v20, %v8150_v18 }
 0xc7d   :  { %10113 = vmatmul.mubr.f32.vlgmr.msra.gmra.mrb[16].mxu0 %v7126_v3 }
 0xc7e   :  { %10116 = vmatpush3.msra.mxu0 %v7061_v9  ;;  %10133 = vmatmul.mubr.f32.vlgmr.msra.gmra.mrb[16].mxu1 %v7579_v25  ;;  %v8137_v9 = vsub.f32 %v8135_v5, %v8136_v7 }
 0xc7f   :  { %10136 = vmatpush3.msra.mxu1 %v11336_v62  ;;  %10117 = vmatprep.mubr.msk.f32.mxu0 %vm10808_vm1, %v10807_v10 }
 0xc80   :  { %10137 = vmatprep.mubr.msk.f32.mxu1 %vm10808_vm1, %v10807_v10  ;;  %10140 = vmatprep.subr.mxu1 %v10807_v10  ;;  %v8138_v15 = vand.u32 4294901760, %v8137_v9 }
 0xc85   :  { %10118 = vmatmul.mubr.f32.vlgmr.msra.gmra.mrb[16].mxu0 %v7126_v3 }
 0xc86   :  { %10138 = vmatmul.mubr.f32.vlgmr.msra.gmra.mrb[16].mxu1 %v7580_v26 }
 0xc87   :  { %10141 = vmatpush3.msra.mxu1 %v7591_v24  ;;  %10142 = vmatprep.mubr.msk.f32.mxu1 %vm10808_vm1, %v10807_v10  ;;  %v8152_v24 = vand.u32 4294901760, %v8151_v22 }
 0xc88   :  { %10145 = vmatprep.subr.mxu1 %v10807_v10 }
 0xc8e   :  { %10143 = vmatmul.mubr.f32.vlgmr.msra.gmra.mrb[16].mxu1 %v7578_v23 }
 0xc8f   :  { %10146 = vmatpush3.msra.mxu1 %v11336_v62  ;;  %10147 = vmatprep.mubr.msk.f32.mxu1 %vm10808_vm1, %v10807_v10  ;;  %v10781_v10 = vld [vmem:[%s11577_s0] sm:$0xff]  ;;  %v8031_v62 = vld [vmem:[%s11579_s2 + $0x8] sm:$0xff] }
 0xc90   :  { %v8048_v63 = vand.u32 4294901760, %v8031_v62 }
 0xc92   :  { %v11410_v3 = vpack.c.bf16 %v8048_v63, %v8045_v19  ;;  %v8142_v6 = vsub.f32 %v8031_v62, %v8048_v63 }
 0xc94   :  { %10379 = vmatprep.subr.bf16.mxu0 %v11410_v3  ;;  %v8143_v8 = vand.u32 4294901760, %v8142_v6  ;;  %v10394_v27 = vpack.c.bf16 %v8142_v6, %v8135_v5 }
 0xc95   :  { %10381 = vmatpush3.bf16.msra.mxu0 %v11410_v3 }
 0xc96   :  { %10148 = vmatmul.mubr.f32.vlgmr.msra.gmra.mrb[16].mxu1 %v7578_v23  ;;  %10383 = vmatprep.subr.bf16.mxu0 %v11412_v4  ;;  %v8144_v13 = vsub.f32 %v8142_v6, %v8143_v8  ;;  %v8158_v23 = vsub.f32 %v8156_v12, %v8157_v20  ;;  %v10410_v29 = vpack.c.bf16 %v8143_v8, %v8136_v7  ;;  %v8616_v20 = vld [vmem:[%s11580_s3 + $0x10] sm:$0xff] }
 0xc98   :  { %v8145_v16 = vand.u32 4294901760, %v8144_v13  ;;  %v8159_v25 = vand.u32 4294901760, %v8158_v23  ;;  %v8614_v13 = vld [vmem:[%s11580_s3] sm:$0xff] }
 0xc99   :  { %10385 = vmatpush3.bf16.msra.mxu0 %v11412_v4  ;;  %v8633_v12 = vand.u32 4294901760, %v8614_v13 }
 0xc9a   :  { %v10386_v21 = vpack.c.bf16 %v8145_v16, %v8138_v15  ;;  %v10390_v26 = vpack.c.bf16 %v8159_v25, %v8152_v24  ;;  %v8636_v15 = vand.u32 4294901760, %v8615_v14  ;;  %v8639_v24 = vand.u32 4294901760, %v8616_v20 }
 0xc9b   :  { %v11455_v16 = vsub.f32 %v8614_v13, %v8633_v12 }
 0xc9c   :  { %10387 = vmatprep.subr.bf16.mxu0 %v10386_v21  ;;  %v11457_v18 = vsub.f32 %v8615_v14, %v8636_v15 }
 0xc9d   :  { %v8728_v22 = vand.u32 4294901760, %v11455_v16 }
 0xc9e   :  { %v8735_v23 = vand.u32 4294901760, %v11457_v18 }
 0xca0   :  { %v10490_v13 = vpack.c.bf16 %v8735_v23, %v8728_v22 }
 0xd58   :  { %v7502_v31 = vpop.f32.mrb[16].mxu0 }
 0xd59   :  { %7976 = vrot.lane.b32.xlu0 %v7502_v31, %s10822_s25  ;;  %v10119_v32 = vpop.f32.mrb[17].mxu0 }
 0xd69   :  { %v7954_v33 = vpop.f32.mrb[16].mxu1 }
 0xd6a   :  { %7978 = vrot.lane.b32.xlu1 %v7954_v33, %s10822_s25  ;;  %v10149_v34 = vpop.f32.mrb[17].mxu1 }
 0xdcb   :  { %v7977_v39 = vpop.permute.xlu0 %7976 }
 0xdcc   :  { %v7988_v40 = vsel %vm7987_vm4, %v7985_v38, %v7977_v39  ;;  %v9273_v38 = vld [vmem:[%s11581_s4 + $0x3] ss:$0 sm:$0xff] }
 0xdcd   :  { %v11381_v41 = vadd.f32 %v10781_v10, %v7988_v40 }
 0xdcf   :  { %v7992_v42 = vsel %vm36_vm0, %v11381_v41, 0.0 }
 0xdd0   :  { %7993 = vadd.xlane.f32.xlu0 %v7992_v42 }
 0xddc   :  { %v7979_v46 = vpop.permute.xlu1 %7978 }
 0xddd   :  { %v7989_v47 = vsel %vm7987_vm4, %v7986_v57, %v7979_v46 }
 0xdde   :  { %v11390_v49 = vadd.f32 %v10782_v48, %v7989_v47 }
 0xde0   :  { %v7995_v50 = vsel %vm36_vm0, %v11390_v49, 0.0 }
 0xde1   :  { %7996 = vadd.xlane.f32.xlu1 %v7995_v50 }
 0xe5d   :  { %v7994_v51 = vpop.xlane.xlu0 %7993 }
 0xe5e   :  { %v7998_v52 = vmul.f32 0.03125, %v7994_v51 }
 0xe60   :  { %v8000_v53 = vsub.f32 %v11381_v41, %v7998_v52 }
 0xe62   :  { %v8002_v54 = vmul.f32 %v8000_v53, %v8000_v53 }
 0xe64   :  { %v8004_v59 = vsel %vm36_vm0, %v8002_v54, 0.0 }
 0xe65   :  { %8005 = vadd.xlane.f32.xlu0 %v8004_v59 }
 0xe6e   :  { %v7997_v55 = vpop.xlane.xlu1 %7996 }
 0xe6f   :  { %v7999_v56 = vmul.f32 0.03125, %v7997_v55 }
 0xe71   :  { %v8001_v58 = vsub.f32 %v11390_v49, %v7999_v56 }
 0xe73   :  { %v8003_v60 = vmul.f32 %v8001_v58, %v8001_v58 }
 0xe75   :  { %v8007_v11 = vsel %vm36_vm0, %v8003_v60, 0.0 }
 0xe76   :  { %8008 = vadd.xlane.f32.xlu0 %v8007_v11 }
 0xef2   :  { %v8006_v31 = vpop.xlane.xlu0 %8005 }
 0xef3   :  { %v8010_v32 = vmul.f32 0.03125, %v8006_v31  ;;  %v8619_v31 = vld [vmem:[%s11580_s3 + $0x28] sm:$0xff] }
 0xef5   :  { %v8012_v33 = vadd.f32 1e-05, %v8010_v32 }
 0xef7   :  { %10769 = vrsqrt.f32 %v8012_v33 }
 0xf01   :  { %v10770_v34 = vpop.eup %10769 }
 0xf02   :  { %v8016_v36 = vmul.f32 %v10770_v34, %v8000_v53 }
 0xf03   :  { %v8009_v37 = vpop.xlane.xlu0 %8008 }
 0xf04   :  { %v8011_v39 = vmul.f32 0.03125, %v8009_v37  ;;  %v8022_v40 = vmul.f32 %v9272_v35, %v8016_v36  ;;  %v8648_v37 = vand.u32 4294901760, %v8619_v31 }
 0xf06   :  { %v8013_v10 = vadd.f32 1e-05, %v8011_v39  ;;  %v8028_v42 = vadd.f32 %v9273_v38, %v8022_v40 }
 0xf08   :  { %10771 = vrsqrt.f32 %v8013_v10  ;;  %v8039_v43 = vsel %vm36_vm0, %v8028_v42, 0  ;;  %v8762_v42 = vsub.f32 %v8619_v31, %v8648_v37 }
 0xf09   :  { %v8113_v44 = vand.u32 4294901760, %v8039_v43 }
 0xf0b   :  { %v8114_v45 = vsub.f32 %v8039_v43, %v8113_v44  ;;  %v8620_v43 = vld [vmem:[%s11580_s3 + $0x30] sm:$0xff] }
 0xf0d   :  { %v8115_v57 = vand.u32 4294901760, %v8114_v45 }
 0xf0f   :  { %v8116_v46 = vsub.f32 %v8114_v45, %v8115_v57 }
 0xf11   :  { %v8117_v47 = vand.u32 4294901760, %v8116_v46  ;;  %v8651_v46 = vand.u32 4294901760, %v8620_v43 }
 0xf12   :  { %v10772_v48 = vpop.eup %10771 }
 0xf13   :  { %v8017_v50 = vmul.f32 %v10772_v48, %v8001_v58  ;;  %10158 = vmatprep.mubr.f32.mxu0 %v8117_v47  ;;  %v9274_v58 = vld [vmem:[%s11582_s5 + $0x2] ss:$0 sm:$0xff] }
 0xf15   :  { %v8023_v51 = vmul.f32 %v9272_v35, %v8017_v50  ;;  %v8763_v50 = vand.u32 4294901760, %v8762_v42 }
 0xf17   :  { %v8029_v52 = vadd.f32 %v9273_v38, %v8023_v51 }
 0xf19   :  { %v8042_v53 = vsel %vm36_vm0, %v8029_v52, 0  ;;  %v8769_v52 = vsub.f32 %v8620_v43, %v8651_v46 }
 0xf1a   :  { %v8123_v54 = vand.u32 4294901760, %v8042_v53 }
 0xf1c   :  { %v8124_v59 = vsub.f32 %v8042_v53, %v8123_v54 }
 0xf1e   :  { %v8125_v55 = vand.u32 4294901760, %v8124_v59 }
 0xf20   :  { %v8126_v56 = vsub.f32 %v8124_v59, %v8125_v55 }
 0xf22   :  { %v8127_v60 = vand.u32 4294901760, %v8126_v56 }
 0xf24   :  { %10159 = vmatmul.mubr.f32.vlgmr.msra.gmra.mrb[18].mxu0 %v8127_v60 }
 0xf25   :  { %10389 = vmatpush3.bf16.msra.mxu0 %v10386_v21  ;;  %10169 = vmatprep.mubr.f32.mxu0 %v8113_v44  ;;  %v8617_v21 = vld [vmem:[%s11580_s3 + $0x18] sm:$0xff] }
 0xf26   :  { %10391 = vmatprep.subr.bf16.mxu0 %v10390_v26  ;;  %v8642_v25 = vand.u32 4294901760, %v8617_v21 }
 0xf28   :  { %v11495_v56 = vpack.c.bf16 %v8642_v25, %v8639_v24 }
 0xf29   :  { %10393 = vmatpush3.bf16.msra.mxu0 %v10390_v26  ;;  %v8729_v26 = vsub.f32 %v11455_v16, %v8728_v22 }
 0xf2a   :  { %10395 = vmatprep.subr.bf16.mxu0 %v10394_v27 }
 0xf2b   :  { %v8730_v32 = vand.u32 4294901760, %v8729_v26 }
 0xf2c   :  { %10170 = vmatmul.mubr.f32.vlgmr.msra.gmra.mrb[18].mxu0 %v8123_v54 }
 0xf2d   :  { %10397 = vmatpush3.bf16.msra.mxu0 %v10394_v27  ;;  %10180 = vmatprep.mubr.f32.mxu0 %v8114_v45  ;;  %v8736_v27 = vsub.f32 %v11457_v18, %v8735_v23  ;;  %v9276_v23 = vld [vmem:[%s11582_s5 + $0x1] ss:$0 sm:$0xff] }
 0xf2e   :  { %10399 = vmatprep.subr.bf16.mxu0 %v10398_v28 }
 0xf2f   :  { %v8737_v33 = vand.u32 4294901760, %v8736_v27 }
 0xf31   :  { %10401 = vmatpush3.bf16.msra.mxu0 %v10398_v28  ;;  %v11473_v28 = vsub.f32 %v8616_v20, %v8639_v24  ;;  %v10442_v38 = vpack.c.bf16 %v8737_v33, %v8730_v32 }
 0xf32   :  { %10403 = vmatprep.subr.bf16.mxu0 %v11410_v3 }
 0xf33   :  { %v8742_v34 = vand.u32 4294901760, %v11473_v28  ;;  %10443 = vmatprep.subr.bf16.mxu1 %v10442_v38 }
 0xf34   :  { %10181 = vmatmul.mubr.f32.vlgmr.msra.gmra.mrb[18].mxu0 %v8124_v59  ;;  %10445 = vmatpush3.bf16.msra.mxu1 %v10442_v38  ;;  %v8764_v59 = vsub.f32 %v8762_v42, %v8763_v50 }
 0xf35   :  { %10405 = vmatpush3.bf16.msra.mxu0 %v11410_v3  ;;  %10191 = vmatprep.mubr.f32.mxu0 %v8115_v57  ;;  %v8743_v39 = vsub.f32 %v11473_v28, %v8742_v34 }
 0xf36   :  { %10407 = vmatprep.subr.bf16.mxu0 %v11412_v4 }
 0xf37   :  { %v8744_v45 = vand.u32 4294901760, %v8743_v39 }
 0xf39   :  { %10409 = vmatpush3.bf16.msra.mxu0 %v11412_v4 }
 0xf3a   :  { %10411 = vmatprep.subr.bf16.mxu0 %v10410_v29 }
 0xf3c   :  { %10192 = vmatmul.mubr.f32.vlgmr.msra.gmra.mrb[18].mxu0 %v8125_v55  ;;  %v11493_v55 = vpack.c.bf16 %v8636_v15, %v8633_v12 }
 0xf3d   :  { %10413 = vmatpush3.bf16.msra.mxu0 %v10410_v29  ;;  %10202 = vmatprep.mubr.f32.mxu0 %v8113_v44  ;;  %v11475_v29 = vsub.f32 %v8617_v21, %v8642_v25 }
 0xf3e   :  { %10415 = vmatprep.subr.bf16.mxu0 %v10414_v30 }
 0xf3f   :  { %v8749_v35 = vand.u32 4294901760, %v11475_v29 }
 0xf41   :  { %10417 = vmatpush3.bf16.msra.mxu0 %v10414_v30  ;;  %v8618_v30 = vld [vmem:[%s11580_s3 + $0x20] sm:$0xff]  ;;  %v8750_v40 = vsub.f32 %v11475_v29, %v8749_v35  ;;  %v10494_v14 = vpack.c.bf16 %v8749_v35, %v8742_v34 }
 0xf42   :  { %10419 = vmatprep.subr.bf16.mxu0 %v11410_v3  ;;  %v8645_v36 = vand.u32 4294901760, %v8618_v30 }
 0xf43   :  { %v8751_v57 = vand.u32 4294901760, %v8750_v40 }
 0xf44   :  { %10203 = vmatmul.mubr.f32.vlgmr.msra.gmra.mrb[18].mxu0 %v8123_v54  ;;  %v8755_v10 = vsub.f32 %v8618_v30, %v8645_v36 }
 0xf45   :  { %10421 = vmatpush3.bf16.msra.mxu0 %v11410_v3  ;;  %10213 = vmatprep.mubr.f32.mxu0 %v8113_v44  ;;  %v8621_v44 = vld [vmem:[%s11580_s3 + $0x38] sm:$0xff]  ;;  %v10446_v51 = vpack.c.bf16 %v8751_v57, %v8744_v45 }
 0xf46   :  { %10423 = vmatprep.subr.bf16.mxu0 %v11412_v4  ;;  %v8654_v47 = vand.u32 4294901760, %v8621_v44  ;;  %v8756_v48 = vand.u32 4294901760, %v8755_v10 }
 0xf47   :  { %10447 = vmatprep.subr.bf16.mxu1 %v10446_v51 }
 0xf48   :  { %v8776_v53 = vsub.f32 %v8621_v44, %v8654_v47  ;;  %10449 = vmatpush3.bf16.msra.mxu1 %v10446_v51  ;;  %v10498_v12 = vpack.c.bf16 %v8763_v50, %v8756_v48 }
 0xf49   :  { %10425 = vmatpush3.bf16.msra.mxu0 %v11412_v4 }
 0xf4a   :  { %10427 = vmatprep.subr.bf16.mxu0 %v11493_v55 }
 0xf4c   :  { %10214 = vmatmul.mubr.f32.vlgmr.msra.gmra.mrb[18].mxu0 %v8123_v54  ;;  %v8757_v54 = vsub.f32 %v8755_v10, %v8756_v48 }
 0xf4d   :  { %10429 = vmatpush3.bf16.msra.mxu0 %v11493_v55 }
 0xf4e   :  { %v8758_v60 = vand.u32 4294901760, %v8757_v54  ;;  %10431 = vmatprep.subr.bf16.mxu0 %v11495_v56 }
 0xf51   :  { %10433 = vmatpush3.bf16.msra.mxu0 %v11495_v56 }
0x101f   :  { %v10215_v11 = vpop.f32.mrb[18].mxu0 }
0x1020   :  { %v10523_v61 = vadd.f32 %v10215_v11, %v9274_v58  ;;  %v8562_v62 = vpop.f32.mrb[19].mxu0  ;;  %v8770_v11 = vand.u32 4294901760, %v8769_v52 }
0x1021   :  { %v10524_v17 = vadd.f32 %v9274_v58, %v8562_v62  ;;  %v8765_v58 = vand.u32 4294901760, %v8764_v59 }
0x1022   :  { %v8576_v19 = vsel %vm8572_vm6, %v10523_v61, 0.0 }
0x1023   :  { %8577 = vadd.xlane.f32.xlu1 %v8576_v19  ;;  %v8573_v63 = vsel %vm8572_vm6, %v10524_v17, 0.0  ;;  %v10450_v62 = vpack.c.bf16 %v8765_v58, %v8758_v60 }
0x1024   :  { %8574 = vadd.xlane.f32.xlu0 %v8573_v63  ;;  %v11499_v63 = vpack.c.bf16 %v8648_v37, %v8645_v36 }
0x1025   :  { %10451 = vmatprep.subr.bf16.mxu1 %v10450_v62 }
0x1026   :  { %10453 = vmatpush3.bf16.msra.mxu1 %v10450_v62  ;;  %10435 = vmatprep.subr.bf16.mxu0 %v11499_v63 }
0x1027   :  { %10437 = vmatpush3.bf16.msra.mxu0 %v11499_v63 }
0x10b0   :  { %v8578_v0 = vpop.xlane.xlu1 %8577 }
0x10b1   :  { %v8581_v1 = vmul.f32 0.015625, %v8578_v0  ;;  %v8575_v2 = vpop.xlane.xlu0 %8574 }
0x10b2   :  { %v8580_v3 = vmul.f32 0.015625, %v8575_v2 }
0x10b3   :  { %v11439_v4 = vsub.f32 %v10523_v61, %v8581_v1  ;;  %v8777_v61 = vand.u32 4294901760, %v8776_v53 }
0x10b4   :  { %v11441_v5 = vsub.f32 %v10524_v17, %v8580_v3  ;;  %v8771_v17 = vsub.f32 %v8769_v52, %v8770_v11  ;;  %v11503_v3 = vpack.c.bf16 %v8654_v47, %v8651_v46  ;;  %v9277_v47 = vld [vmem:[%s11581_s4 + $0x6] ss:$0 sm:$0xff] }
0x10b5   :  { %v8585_v6 = vmul.f32 %v11439_v4, %v11439_v4  ;;  %v8778_v19 = vsub.f32 %v8776_v53, %v8777_v61  ;;  %v11517_v15 = vpack.c.bf16 %v8777_v61, %v8770_v11 }
0x10b6   :  { %v8584_v7 = vmul.f32 %v11441_v5, %v11441_v5  ;;  %v8772_v0 = vand.u32 4294901760, %v8771_v17  ;;  %10439 = vmatprep.subr.bf16.mxu0 %v11503_v3 }
0x10b7   :  { %v8589_v8 = vsel %vm8572_vm6, %v8585_v6, 0.0  ;;  %v8779_v1 = vand.u32 4294901760, %v8778_v19  ;;  %v10458_v6 = vpack.c.bf16 %v11457_v18, %v11455_v16  ;;  %10441 = vmatpush3.bf16.msra.mxu0 %v11503_v3  ;;  %v9275_v16 = vld [vmem:[%s11582_s5] ss:$0 sm:$0xff] }
0x10b8   :  { %8590 = vadd.xlane.f32.xlu1 %v8589_v8  ;;  %v8586_v9 = vsel %vm8572_vm6, %v8584_v7, 0.0  ;;  %v10462_v7 = vpack.c.bf16 %v11475_v29, %v11473_v28  ;;  %v10466_v8 = vpack.c.bf16 %v8762_v42, %v8755_v10 }
0x10b9   :  { %8587 = vadd.xlane.f32.xlu0 %v8586_v9  ;;  %v10454_v2 = vpack.c.bf16 %v8779_v1, %v8772_v0  ;;  %v10470_v9 = vpack.c.bf16 %v8776_v53, %v8769_v52 }
0x10bb   :  { %10455 = vmatprep.subr.bf16.mxu1 %v10454_v2 }
0x10bc   :  { %10457 = vmatpush3.bf16.msra.mxu1 %v10454_v2 }
0x10bd   :  { %10459 = vmatprep.subr.bf16.mxu1 %v10458_v6 }
0x1145   :  { %v8591_v20 = vpop.xlane.xlu1 %8590 }
0x1146   :  { %v8593_v21 = vmul.f32 0.015625, %v8591_v20  ;;  %v8588_v24 = vpop.xlane.xlu0 %8587  ;;  %v9279_v20 = vld [vmem:[%s11581_s4 + $0x5] ss:$0 sm:$0xff] }
0x1147   :  { %v8592_v25 = vmul.f32 0.015625, %v8588_v24 }
0x1148   :  { %v8595_v26 = vadd.f32 1e-05, %v8593_v21 }
0x1149   :  { %v8594_v27 = vadd.f32 1e-05, %v8592_v25 }
0x114a   :  { %10773 = vrsqrt.f32 %v8595_v26 }
0x114b   :  { %10775 = vrsqrt.f32 %v8594_v27 }
0x1154   :  { %v10774_v28 = vpop.eup %10773 }
0x1155   :  { %v10776_v29 = vpop.eup %10775  ;;  %v8599_v18 = vmul.f32 %v10774_v28, %v11439_v4 }
0x1156   :  { %v8598_v22 = vmul.f32 %v10776_v29, %v11441_v5 }
0x1157   :  { %v8605_v30 = vmul.f32 %v9275_v16, %v8599_v18 }
0x1158   :  { %v8604_v31 = vmul.f32 %v9275_v16, %v8598_v22 }
0x1159   :  { %v8611_v32 = vadd.f32 %v9276_v23, %v8605_v30 }
0x115a   :  { %v8610_v33 = vadd.f32 %v9276_v23, %v8604_v31 }
0x115b   :  { %v8613_v34 = vmax.f32 %v8611_v32, 0.0 }
0x115c   :  { %v8612_v35 = vmax.f32 %v8610_v33, 0.0 }
0x115d   :  { %v8630_v36 = vsel %vm8572_vm6, %v8613_v34, 0 }
0x115e   :  { %v8627_v37 = vsel %vm8572_vm6, %v8612_v35, 0  ;;  %v8715_v38 = vand.u32 4294901760, %v8630_v36 }
0x115f   :  { %v8705_v39 = vand.u32 4294901760, %v8627_v37 }
0x1160   :  { %v8716_v40 = vsub.f32 %v8630_v36, %v8715_v38 }
0x1161   :  { %10251 = vmatprep.mubr.f32.mxu1 %v8705_v39  ;;  %v8706_v4 = vsub.f32 %v8627_v37, %v8705_v39 }
0x1162   :  { %10252 = vmatmul.mubr.f32.vlgmr.msra.gmra.mrb[18].mxu1 %v8715_v38  ;;  %v8717_v5 = vand.u32 4294901760, %v8716_v40 }
0x1163   :  { %10461 = vmatpush3.bf16.msra.mxu1 %v10458_v6  ;;  %10270 = vmatprep.mubr.f32.mxu1 %v8706_v4  ;;  %v8707_v10 = vand.u32 4294901760, %v8706_v4 }
0x1164   :  { %10463 = vmatprep.subr.bf16.mxu1 %v10462_v7  ;;  %v8718_v42 = vsub.f32 %v8716_v40, %v8717_v5 }
0x1165   :  { %v8708_v43 = vsub.f32 %v8706_v4, %v8707_v10 }
0x1166   :  { %v8719_v45 = vand.u32 4294901760, %v8718_v42 }
0x1167   :  { %10465 = vmatpush3.bf16.msra.mxu1 %v10462_v7  ;;  %v8709_v44 = vand.u32 4294901760, %v8708_v43 }
0x1168   :  { %10467 = vmatprep.subr.bf16.mxu1 %v10466_v8 }
0x1169   :  { %10232 = vmatprep.mubr.f32.mxu0 %v8709_v44 }
0x116a   :  { %10233 = vmatmul.mubr.f32.vlgmr.msra.gmra.mrb[20].mxu0 %v8719_v45 }
0x116b   :  { %10469 = vmatpush3.bf16.msra.mxu1 %v10466_v8 }
0x116c   :  { %10471 = vmatprep.subr.bf16.mxu1 %v10470_v9 }
0x116f   :  { %10473 = vmatpush3.bf16.msra.mxu1 %v10470_v9 }
0x1170   :  { %10475 = vmatprep.subr.bf16.mxu1 %v11493_v55 }
0x1172   :  { %10271 = vmatmul.mubr.f32.vlgmr.msra.gmra.mrb[18].mxu1 %v8716_v40 }
0x1173   :  { %10477 = vmatpush3.bf16.msra.mxu1 %v11493_v55  ;;  %10289 = vmatprep.mubr.f32.mxu1 %v8707_v10 }
0x1174   :  { %10479 = vmatprep.subr.bf16.mxu1 %v11495_v56 }
0x1177   :  { %10481 = vmatpush3.bf16.msra.mxu1 %v11495_v56 }
0x1178   :  { %10483 = vmatprep.subr.bf16.mxu1 %v11499_v63 }
0x117b   :  { %10485 = vmatpush3.bf16.msra.mxu1 %v11499_v63 }
0x117c   :  { %10487 = vmatprep.subr.bf16.mxu1 %v11503_v3 }
0x117f   :  { %10489 = vmatpush3.bf16.msra.mxu1 %v11503_v3 }
0x1180   :  { %10491 = vmatprep.subr.bf16.mxu1 %v10490_v13 }
0x1182   :  { %10290 = vmatmul.mubr.f32.vlgmr.msra.gmra.mrb[18].mxu1 %v8717_v5 }
0x1183   :  { %10493 = vmatpush3.bf16.msra.mxu1 %v10490_v13  ;;  %10308 = vmatprep.mubr.f32.mxu1 %v8705_v39  ;;  %v9278_v13 = vld [vmem:[%s11581_s4 + $0x4] ss:$0 sm:$0xff] }
0x1184   :  { %10495 = vmatprep.subr.bf16.mxu1 %v10494_v14 }
0x1187   :  { %10497 = vmatpush3.bf16.msra.mxu1 %v10494_v14 }
0x1188   :  { %10499 = vmatprep.subr.bf16.mxu1 %v10498_v12 }
0x118b   :  { %10501 = vmatpush3.bf16.msra.mxu1 %v10498_v12 }
0x118c   :  { %10503 = vmatprep.subr.bf16.mxu1 %v11517_v15 }
0x118f   :  { %10505 = vmatpush3.bf16.msra.mxu1 %v11517_v15 }
0x1190   :  { %10507 = vmatprep.subr.bf16.mxu1 %v11493_v55 }
0x1192   :  { %10309 = vmatmul.mubr.f32.vlgmr.msra.gmra.mrb[18].mxu1 %v8715_v38 }
0x1193   :  { %10509 = vmatpush3.bf16.msra.mxu1 %v11493_v55  ;;  %10327 = vmatprep.mubr.f32.mxu1 %v8705_v39 }
0x1194   :  { %10511 = vmatprep.subr.bf16.mxu1 %v11495_v56 }
0x1197   :  { %10513 = vmatpush3.bf16.msra.mxu1 %v11495_v56 }
0x1198   :  { %10515 = vmatprep.subr.bf16.mxu1 %v11499_v63 }
0x119b   :  { %10517 = vmatpush3.bf16.msra.mxu1 %v11499_v63 }
0x119c   :  { %10519 = vmatprep.subr.bf16.mxu1 %v11503_v3 }
0x119f   :  { %10521 = vmatpush3.bf16.msra.mxu1 %v11503_v3 }
0x11a2   :  { %10328 = vmatmul.mubr.f32.vlgmr.msra.gmra.mrb[18].mxu1 %v8715_v38 }
0x123d   :  { %v10234_v57 = vpop.f32.mrb[20].mxu0 }
0x123e   :  { %v8711_v46 = vpop.f32.mrb[21].mxu0  ;;  %v8722_v48 = vadd.f32 %v10234_v57, %v9277_v47 }
0x123f   :  { %v8712_v50 = vadd.f32 %v9277_v47, %v8711_v46 }
0x1275   :  { %v10329_v51 = vpop.f32.mrb[18].mxu1 }
0x1276   :  { %v10526_v52 = vadd.f32 %v10329_v51, %v8722_v48  ;;  %v9202_v53 = vpop.f32.mrb[19].mxu1 }
0x1277   :  { %v10528_v54 = vadd.f32 %v9202_v53, %v8712_v50 }
0x1278   :  { %v9215_v59 = vsel %vm36_vm0, %v10526_v52, 0.0 }
0x1279   :  { %9216 = vadd.xlane.f32.xlu1 %v9215_v59  ;;  %v9212_v55 = vsel %vm36_vm0, %v10528_v54, 0.0 }
0x127a   :  { %9213 = vadd.xlane.f32.xlu0 %v9212_v55 }
0x1306   :  { %v9217_v56 = vpop.xlane.xlu1 %9216 }
0x1307   :  { %v9219_v60 = vmul.f32 0.03125, %v9217_v56  ;;  %v9214_v58 = vpop.xlane.xlu0 %9213 }
0x1308   :  { %v9218_v11 = vmul.f32 0.03125, %v9214_v58 }
0x1309   :  { %v9221_v61 = vsub.f32 %v10526_v52, %v9219_v60 }
0x130a   :  { %v9220_v62 = vsub.f32 %v10528_v54, %v9218_v11 }
0x130b   :  { %v9223_v17 = vmul.f32 %v9221_v61, %v9221_v61 }
0x130c   :  { %v9222_v19 = vmul.f32 %v9220_v62, %v9220_v62 }
0x130d   :  { %v9227_v63 = vsel %vm36_vm0, %v9223_v17, 0.0 }
0x130e   :  { %9228 = vadd.xlane.f32.xlu1 %v9227_v63  ;;  %v9224_v0 = vsel %vm36_vm0, %v9222_v19, 0.0 }
0x130f   :  { %9225 = vadd.xlane.f32.xlu0 %v9224_v0 }
0x139b   :  { %v9229_v1 = vpop.xlane.xlu1 %9228 }
0x139c   :  { %v9231_v2 = vmul.f32 0.03125, %v9229_v1  ;;  %v9226_v3 = vpop.xlane.xlu0 %9225 }
0x139d   :  { %v9230_v6 = vmul.f32 0.03125, %v9226_v3 }
0x139e   :  { %v9233_v7 = vadd.f32 1e-05, %v9231_v2 }
0x139f   :  { %v9232_v8 = vadd.f32 1e-05, %v9230_v6 }
0x13a0   :  { %10777 = vrsqrt.f32 %v9233_v7 }
0x13a1   :  { %10779 = vrsqrt.f32 %v9232_v8 }
0x13aa   :  { %v10778_v9 = vpop.eup %10777 }
0x13ab   :  { %v10780_v14 = vpop.eup %10779  ;;  %v9237_v12 = vmul.f32 %v10778_v9, %v9221_v61 }
0x13ac   :  { %v9236_v15 = vmul.f32 %v10780_v14, %v9220_v62 }
0x13ad   :  { %v9243_v21 = vmul.f32 %v9278_v13, %v9237_v12 }
0x13ae   :  { %v9242_v24 = vmul.f32 %v9278_v13, %v9236_v15 }
0x13af   :  { %v9249_v25 = vadd.f32 %v9279_v20, %v9243_v21 }
0x13b0   :  { %v9248_v26 = vadd.f32 %v9279_v20, %v9242_v24 }
0x13b1   :  { %v9251_v27 = vadd.f32 %v9249_v25, %v11390_v49 }
0x13b2   :  { %v9250_v28 = vadd.f32 %v9248_v26, %v11381_v41 }
0x13b3   :  { %9253 = vst.msk [vmem:[#allocation2 + $0x8] sm:$0xff] %vm36_vm0, %v9251_v27 }
0x13b4   :  { %9252 = vst.msk [vmem:[#allocation2] sm:$0xff] %vm36_vm0, %v9250_v28 }
0x13b5   :  { %10794 = shalt.err (!%p10791_p4)
}
0x13b6   :  { %s10795_s19 = scalar_lea.hbm %s11583_s6, 256 }
0x13b7   :  { %p10796_p5 = scmp.ne.s32.totalorder %s11583_s6, %s10795_s19  ;;  %p10799_p6 = scmp.lt.u32.totalorder %s10795_s19, %s11583_s6 }
0x13b9   :  { %p10801_p7 = pnand %p10799_p6, %p10796_p5 }
0x13bb   :  { %10804 = shalt.err (!%p10801_p7)
}
0x13bc   :  { %s10824_s25 = smov 128  }
0x13bd   :  { %9265 = dma.vmem_to_hbm [thread:$0]  %s9260_s16, 256, %s11583_s6, [#allocation3], %s10824_s25, %s10824_s25, %s10820_s23  }
0x13be   :  { %10805 = dma.done.wait [#allocation3], 256  }
0x13bf   :  { %10806 = vsyncadd [#allocation3], 4294967040 }
0x13c0   :  { %9269 = vsyncpa [#allocation3], 1 }

</bundles_post_ra>
